<compile_context>
chip_gen: v6e
topology: v6e:2x2x1
jax: 0.10.0
libtpu: 0.0.40
codegen_flags: <defaults>
</compile_context>

<pallas_src>
import math
import functools

import jax
import jax.numpy as jnp
from jax.experimental import pallas as pl
from jax.experimental.pallas import tpu as pltpu


# --------------------------------- helpers ---------------------------------

def _next_pow2(n):
    return max(8, 1 << max(0, int(n) - 1).bit_length())


def _round_up(n, m):
    return ((n + m - 1) // m) * m


def _pick_b_blk(batch, s_pad):
    blk = max(1, 128 // s_pad)                  # fill ~128 sublanes / MXU M rows
    if batch >= 2:
        blk = min(blk, max(1, batch // 2))      # keep >= 2 grid steps (v7x megacore)
    return max(1, min(blk, batch))


def _const_spec(shape):
    """Weight block shared across the batch grid axis."""
    nd = len(shape)
    return pl.BlockSpec(shape, lambda *_, _nd=nd: (0,) * _nd)


# --------------------------- fused transformer kernel ---------------------------

def _fused_decoder_kernel(
    t_emb_ref, src_ref, pe_ref, motion_w_ref,
    wqkv_ref, wo_ref, w1_ref, w2_ref,
    lbias_ref, gbias_ref, out_w_ref,
    o_ref,
    *, n_layers, n_head, d_k, d_v, d_model, d_inner, seq_len, s_pad, b_blk, eps):
    f32 = jnp.float32
    bf16 = jnp.bfloat16
    m = b_blk * s_pad
    hdk = n_head * d_k
    hdv = n_head * d_v
    qkv_w = 2 * hdk + hdv
    shift = s_pad.bit_length() - 1              # s_pad is a power of two
    lane_mask = s_pad - 1

    # ---- assemble (m, d_model) token slab: time token at row 0 of each sample,
    #      motion embedding for rows 1..T, + positional embedding ------------------
    src = src_ref[...].reshape(m, src_ref.shape[-1])
    tok = jnp.dot(src.astype(bf16), motion_w_ref[...], preferred_element_type=f32)
    tok = tok + gbias_ref[0:1, 0:d_model]                                  # motion bias
    t_slab = jnp.broadcast_to(t_emb_ref[...],
                              (b_blk, s_pad, d_model)).reshape(m, d_model)
    pe_slab = jnp.broadcast_to(pe_ref[...][None],
                               (b_blk, s_pad, d_model)).reshape(m, d_model)
    pos = jax.lax.broadcasted_iota(jnp.int32, (m, d_model), 0) & lane_mask
    x = jnp.where(pos == 0, t_slab, tok) + pe_slab

    # ---- block-diagonal key mask: same sample AND real (non-padded) key ----------
    r = jax.lax.broadcasted_iota(jnp.int32, (m, m), 0)
    c = jax.lax.broadcasted_iota(jnp.int32, (m, m), 1)
    mask = ((r >> shift) == (c >> shift)) & ((c & lane_mask) < seq_len)
    neg_big = f32(-1e30)
    scale = f32(1.0 / math.sqrt(d_k))

    def layer_norm(v, g, b):
        mu = jnp.mean(v, axis=-1, keepdims=True)
        var = jnp.mean(jnp.square(v - mu), axis=-1, keepdims=True)
        return (v - mu) * jax.lax.rsqrt(var + eps) * g + b

    for l in range(n_layers):
        bl = lbias_ref[l]                          # (8, bias_lanes) f32
        bqkv = bl[0:1, 0:qkv_w]
        bo   = bl[1:2, 0:d_model]
        g1   = bl[2:3, 0:d_model]
        be1  = bl[3:4, 0:d_model]
        b1   = bl[4:5, 0:d_inner]
        b2   = bl[5:6, 0:d_model]
        g2   = bl[6:7, 0:d_model]
        be2  = bl[7:8, 0:d_model]

        # ---- multi-head self-attention (post-norm), fused QKV projection ----
        resid = x
        qkv = jnp.dot(x.astype(bf16), wqkv_ref[l],
                      preferred_element_type=f32) + bqkv                  # (m, qkv_w)
        heads = []
        for h in range(n_head):
            qh = qkv[:, h * d_k:(h + 1) * d_k]
            kh = qkv[:, hdk + h * d_k:hdk + (h + 1) * d_k]
            vh = qkv[:, 2 * hdk + h * d_v:2 * hdk + (h + 1) * d_v]
            s = jax.lax.dot_general(qh.astype(bf16), kh.astype(bf16),
                                    (((1,), (1,)), ((), ())),
                                    preferred_element_type=f32) * scale   # (m, m)
            s = jnp.where(mask, s, neg_big)
            s = s - jnp.max(s, axis=-1, keepdims=True)
            p = jnp.exp(s)
            p = p * pl.reciprocal(jnp.sum(p, axis=-1, keepdims=True), approx=True)
            heads.append(jnp.dot(p.astype(bf16), vh.astype(bf16),
                                 preferred_element_type=f32))             # (m, d_v)
        head_cat = jnp.concatenate(heads, axis=-1)                        # (m, hdv)
        attn = jnp.dot(head_cat.astype(bf16), wo_ref[l],
                       preferred_element_type=f32) + bo
        x = layer_norm(attn + resid, g1, be1)

        # ---- position-wise feed-forward (ReLU) ----
        resid = x
        hdn = jnp.dot(x.astype(bf16), w1_ref[l], preferred_element_type=f32) + b1
        hdn = jnp.maximum(hdn, 0.0)
        hdn = jnp.dot(hdn.astype(bf16), w2_ref[l], preferred_element_type=f32) + b2
        x = layer_norm(hdn + resid, g2, be2)

    # ---- lane-dense (zero-padded to 128 features) output store ----
    f_pad = o_ref.shape[-1]
    y = jnp.dot(x.astype(bf16), out_w_ref[...], preferred_element_type=f32)
    y = y + gbias_ref[1:2, 0:f_pad]
    o_ref[...] = y.reshape(b_blk, s_pad, f_pad)


# ------------------------------ model parameters --------------------------------

def sinusoidal_pe_table(n_rows, d_model):
    pos = jnp.arange(n_rows, dtype=jnp.float32)[:, None]
    i = jnp.arange(d_model)[None, :]
    rates = 1.0 / jnp.power(10000.0, (2.0 * (i // 2)).astype(jnp.float32) / d_model)
    ang = pos * rates
    return jnp.where(i % 2 == 0, jnp.sin(ang), jnp.cos(ang)).astype(jnp.float32)


def init_params(key, cfg):
    d_feats = cfg["d_feats"]
    d_in = d_feats + cfg["d_imu"]
    d_model = cfg["d_model"]
    n_head, d_k, d_v = cfg["n_head"], cfg["d_k"], cfg["d_v"]
    d_inner = 4 * d_model
    L = cfg["n_dec_layers"]
    hdk, hdv = n_head * d_k, n_head * d_v
    qkv_w = 2 * hdk + hdv
    bias_lanes = _round_up(max(d_inner, qkv_w, d_model), 128)
    f_pad = _round_up(d_feats, 128)
    g_lanes = max(f_pad, _round_up(d_model, 128))
    dim = 64
    time_dim = dim * 4

    def dense(k, din, dout, scale=0.02):
        return (jax.random.normal(k, (din, dout), jnp.float32) * scale,
                jnp.zeros((dout,), jnp.float32))

    keys = iter(jax.random.split(key, 8 + 8 * L))
    p = {}
    p["time_w1"], p["time_b1"] = dense(next(keys), dim, time_dim)
    p["time_w2"], p["time_b2"] = dense(next(keys), time_dim, d_model)

    mw, mb = dense(next(keys), d_in, d_model)
    p["motion_w"] = mw.astype(jnp.bfloat16)

    ow, ob = dense(next(keys), d_model, d_feats)
    out_w = jnp.zeros((d_model, f_pad), jnp.float32).at[:, :d_feats].set(ow)
    p["out_w"] = out_w.astype(jnp.bfloat16)

    gbias = jnp.zeros((2, g_lanes), jnp.float32)
    gbias = gbias.at[0, :d_model].set(mb)            # motion embed bias
    gbias = gbias.at[1, :d_feats].set(ob)            # linear_out bias
    p["gbias"] = gbias

    # enough rows for pos_vec = 1..s_pad even at T == max_timesteps
    p["pe_table"] = sinusoidal_pe_table(1 + _next_pow2(cfg["max_timesteps"] + 1),
                                        d_model)

    wqkv, wo, w1, w2, lbias = [], [], [], [], []
    for _ in range(L):
        wq_f, bq_f = dense(next(keys), d_model, hdk)
        wk_f, bk_f = dense(next(keys), d_model, hdk)
        wv_f, bv_f = dense(next(keys), d_model, hdv)
        wo_f, bo_f = dense(next(keys), hdv, d_model)
        w1_f, b1_f = dense(next(keys), d_model, d_inner)
        w2_f, b2_f = dense(next(keys), d_inner, d_model)

        wqkv.append(jnp.concatenate([wq_f, wk_f, wv_f], axis=1))   # (d_model, qkv_w)
        wo.append(wo_f)
        w1.append(w1_f)
        w2.append(w2_f)

        rows = jnp.zeros((8, bias_lanes), jnp.float32)
        rows = rows.at[0, :qkv_w].set(jnp.concatenate([bq_f, bk_f, bv_f]))
        rows = rows.at[1, :d_model].set(bo_f)
        rows = rows.at[2, :d_model].set(jnp.ones((d_model,), jnp.float32))   # LN1 g
        # row 3: LN1 beta (zeros)
        rows = rows.at[4, :d_inner].set(b1_f)
        rows = rows.at[5, :d_model].set(b2_f)
        rows = rows.at[6, :d_model].set(jnp.ones((d_model,), jnp.float32))   # LN2 g
        # row 7: LN2 beta (zeros)
        lbias.append(rows)

    p["wqkv"] = jnp.stack(wqkv).astype(jnp.bfloat16)
    p["wo"] = jnp.stack(wo).astype(jnp.bfloat16)
    p["w1"] = jnp.stack(w1).astype(jnp.bfloat16)
    p["w2"] = jnp.stack(w2).astype(jnp.bfloat16)
    p["lbias"] = jnp.stack(lbias)
    return p


# -------------------------------- forward pass -----------------------------------

def _time_embed(params, noise_t):
    # SinusoidalPosEmb(64) -> Linear(64,256) -> GELU(erf) -> Linear(256,d_model)
    dim = 64
    half = dim // 2
    freq = jnp.exp(jnp.arange(half, dtype=jnp.float32) *
                   (-math.log(10000.0) / (half - 1)))
    arg = noise_t.astype(jnp.float32)[:, None] * freq[None, :]
    te = jnp.concatenate([jnp.sin(arg), jnp.cos(arg)], axis=-1)
    h = te @ params["time_w1"] + params["time_b1"]
    h = jax.nn.gelu(h, approximate=False)
    return h @ params["time_w2"] + params["time_b2"]            # (B, d_model)


def transformer_diffusion_forward(params, src, noise_t, cfg):
    B, T, d_in = src.shape
    d_feats = cfg["d_feats"]
    d_model = cfg["d_model"]
    n_head, d_k, d_v = cfg["n_head"], cfg["d_k"], cfg["d_v"]
    L = cfg["n_dec_layers"]
    d_inner = params["w1"].shape[-1]
    f_pad = params["out_w"].shape[-1]
    bias_lanes = params["lbias"].shape[-1]
    g_lanes = params["gbias"].shape[-1]

    S = T + 1                                   # time/obj token + motion tokens
    s_pad = _next_pow2(S)                       # power of two -> shift/and masks
    b_blk = _pick_b_blk(B, s_pad)
    n_blocks = -(-B // b_blk)
    B_pad = n_blocks * b_blk

    # ---- time_mlp (XLA glue; sin/cos + erf GELU) ----
    t_emb = _time_embed(params, noise_t)[:, None, :]             # (B, 1, d_model)

    src_f = src.astype(jnp.float32)
    if B_pad != B:
        src_f = jnp.pad(src_f, ((0, B_pad - B), (0, 0), (0, 0)))
        t_emb = jnp.pad(t_emb, ((0, B_pad - B), (0, 0), (0, 0)))

    # single pad: row 0 = time-token placeholder, rows S..s_pad-1 = seq padding
    src_slab = jnp.pad(src_f, ((0, 0), (1, s_pad - S), (0, 0)))  # (B_pad, s_pad, d_in)

    # PE rows for pos_vec = 1..s_pad (rows beyond S are masked / sliced away)
    pe = params["pe_table"][1:1 + s_pad]                         # (s_pad, d_model)

    kernel = functools.partial(
        _fused_decoder_kernel, n_layers=L, n_head=n_head, d_k=d_k, d_v=d_v,
        d_model=d_model, d_inner=d_inner, seq_len=S, s_pad=s_pad, b_blk=b_blk,
        eps=1e-5)

    out_pad = pl.pallas_call(
        kernel,
        out_shape=jax.ShapeDtypeStruct((B_pad, s_pad, f_pad), jnp.float32),
        grid=(n_blocks,),
        in_specs=[
            pl.BlockSpec((b_blk, 1, d_model), lambda b: (b, 0, 0)),       # time token
            pl.BlockSpec((b_blk, s_pad, d_in), lambda b: (b, 0, 0)),      # src slab
            _const_spec((s_pad, d_model)),                                # pos. emb
            _const_spec((d_in, d_model)),                                 # motion W
            _const_spec((L, d_model, 2 * n_head * d_k + n_head * d_v)),   # fused QKV
            _const_spec((L, n_head * d_v, d_model)),                      # Wo
            _const_spec((L, d_model, d_inner)),                           # FFN W1
            _const_spec((L, d_inner, d_model)),                           # FFN W2
            _const_spec((L, 8, bias_lanes)),                              # layer biases/LN
            _const_spec((2, g_lanes)),                                    # motion/out bias
            _const_spec((d_model, f_pad)),                                # linear_out W
        ],
        out_specs=pl.BlockSpec((b_blk, s_pad, f_pad), lambda b: (b, 0, 0)),
        compiler_params=pltpu.CompilerParams(
            dimension_semantics=("parallel",)),     # v7x: shard batch over 2 TCs
    )(t_emb, src_slab, pe,
      params["motion_w"], params["wqkv"], params["wo"], params["w1"], params["w2"],
      params["lbias"], params["gbias"], params["out_w"])

    return out_pad[:B, 1:S, :d_feats]                              # (B, T, d_feats)


# --------------------------- pure-JAX reference (f32) ----------------------------

def _reference_forward(params, src, noise_t, cfg):
    B, T, _ = src.shape
    d_feats = cfg["d_feats"]
    d_model = cfg["d_model"]
    n_head, d_k, d_v = cfg["n_head"], cfg["d_k"], cfg["d_v"]
    L = cfg["n_dec_layers"]
    d_inner = params["w1"].shape[-1]
    hdk, hdv = n_head * d_k, n_head * d_v
    S = T + 1
    f32 = jnp.float32

    t_emb = _time_embed(params, noise_t)[:, None, :]
    tok = src.astype(f32) @ params["motion_w"].astype(f32) + params["gbias"][0, :d_model]
    pe = params["pe_table"][1:1 + S]
    x = jnp.concatenate([t_emb, tok], axis=1) + pe[None]

    def ln(v, g, b):
        mu = v.mean(-1, keepdims=True)
        var = ((v - mu) ** 2).mean(-1, keepdims=True)
        return (v - mu) / jnp.sqrt(var + 1e-5) * g + b

    for l in range(L):
        bl = params["lbias"][l]
        qkv = x @ params["wqkv"][l].astype(f32) + bl[0, :2 * hdk + hdv]
        q = qkv[..., :hdk].reshape(B, S, n_head, d_k)
        k = qkv[..., hdk:2 * hdk].reshape(B, S, n_head, d_k)
        v = qkv[..., 2 * hdk:2 * hdk + hdv].reshape(B, S, n_head, d_v)
        s = jnp.einsum("bqhd,bkhd->bhqk", q, k) / math.sqrt(d_k)
        p = jax.nn.softmax(s, axis=-1)
        o = jnp.einsum("bhqk,bkhd->bqhd", p, v).reshape(B, S, hdv)
        attn = o @ params["wo"][l].astype(f32) + bl[1, :d_model]
        x = ln(attn + x, bl[2, :d_model], bl[3, :d_model])
        h = jnp.maximum(x @ params["w1"][l].astype(f32) + bl[4, :d_inner], 0.0)
        h = h @ params["w2"][l].astype(f32) + bl[5, :d_model]
        x = ln(h + x, bl[6, :d_model], bl[7, :d_model])

    f_pad = params["out_w"].shape[-1]
    out = x @ params["out_w"].astype(f32) + params["gbias"][1, :f_pad]
    return out[:, 1:, :d_feats]


# ------------------------------------ main ---------------------------------------

if __name__ == "__main__":
    cfg = dict(d_feats=12, d_model=32, d_imu=4, n_dec_layers=2,
               n_head=2, d_k=16, d_v=16, max_timesteps=64)

    key = jax.random.PRNGKey(0)
    k_param, k_src, k_t = jax.random.split(key, 3)

    params = init_params(k_param, cfg)

    B, T = 2, 8
    src = jax.random.normal(k_src, (B, T, cfg["d_feats"] + cfg["d_imu"]), jnp.float32)
    noise_t = jax.random.randint(k_t, (B,), 0, 1000).astype(jnp.float32)

    fwd = jax.jit(functools.partial(transformer_diffusion_forward, cfg=cfg))
    out = jax.block_until_ready(fwd(params, src, noise_t))

    assert out.shape == (B, T, cfg["d_feats"]), out.shape
    assert bool(jnp.all(jnp.isfinite(out)))

    ref = jax.jit(functools.partial(_reference_forward, cfg=cfg))(params, src, noise_t)
    err = float(jnp.max(jnp.abs(out - ref)))
    assert err < 3e-2, f"max |kernel - reference| = {err}"   # bf16-operand tolerance

    print("KERNEL_OK")
</pallas_src>

<mosaic_0001>
module attributes {stable_mosaic.version = 11 : i64} {
  func.func @_fused_decoder_kernel(%arg0: i32, %arg1: memref<1x1x32xf32, #tpu.memory_space<vmem>>, %arg2: memref<1x16x16xf32, #tpu.memory_space<vmem>>, %arg3: memref<16x32xf32, #tpu.memory_space<vmem>>, %arg4: memref<16x32xbf16, #tpu.memory_space<vmem>>, %arg5: memref<2x32x96xbf16, #tpu.memory_space<vmem>>, %arg6: memref<2x32x32xbf16, #tpu.memory_space<vmem>>, %arg7: memref<2x32x128xbf16, #tpu.memory_space<vmem>>, %arg8: memref<2x128x32xbf16, #tpu.memory_space<vmem>>, %arg9: memref<2x8x128xf32, #tpu.memory_space<vmem>>, %arg10: memref<2x128xf32, #tpu.memory_space<vmem>>, %arg11: memref<32x128xbf16, #tpu.memory_space<vmem>>, %arg12: memref<1x16x128xf32, #tpu.memory_space<vmem>>) attributes {dimension_semantics = [#tpu.dimension_semantics<parallel>], iteration_bounds = array<i64: 2>, scalar_prefetch = 0 : i64, scratch_operands = 0 : i64, tpu.core_type = #tpu.core_type<tc>, window_params = [{transform_indices = @transform_0, window_bounds = array<i64: 1, 1, 32>}, {transform_indices = @transform_1, window_bounds = array<i64: 1, 16, 16>}, {pipeline_mode = #tpu.pipeline_mode<synchronous>, transform_indices = @transform_2, window_bounds = array<i64: 16, 32>}, {pipeline_mode = #tpu.pipeline_mode<synchronous>, transform_indices = @transform_3, window_bounds = array<i64: 16, 32>}, {pipeline_mode = #tpu.pipeline_mode<synchronous>, transform_indices = @transform_4, window_bounds = array<i64: 2, 32, 96>}, {pipeline_mode = #tpu.pipeline_mode<synchronous>, transform_indices = @transform_5, window_bounds = array<i64: 2, 32, 32>}, {pipeline_mode = #tpu.pipeline_mode<synchronous>, transform_indices = @transform_6, window_bounds = array<i64: 2, 32, 128>}, {pipeline_mode = #tpu.pipeline_mode<synchronous>, transform_indices = @transform_7, window_bounds = array<i64: 2, 128, 32>}, {pipeline_mode = #tpu.pipeline_mode<synchronous>, transform_indices = @transform_8, window_bounds = array<i64: 2, 8, 128>}, {pipeline_mode = #tpu.pipeline_mode<synchronous>, transform_indices = @transform_9, window_bounds = array<i64: 2, 128>}, {pipeline_mode = #tpu.pipeline_mode<synchronous>, transform_indices = @transform_10, window_bounds = array<i64: 32, 128>}, {transform_indices = @transform_11, window_bounds = array<i64: 1, 16, 128>}]} {
    %c0 = arith.constant 0 : index
    %c0_0 = arith.constant 0 : index
    %c0_1 = arith.constant 0 : index
    %0 = vector.load %arg2[%c0, %c0_0, %c0_1] : memref<1x16x16xf32, #tpu.memory_space<vmem>>, vector<1x16x16xf32>
    %1 = vector.shape_cast %0 : vector<1x16x16xf32> to vector<16x16xf32>
    %2 = arith.truncf %1 : vector<16x16xf32> to vector<16x16xbf16>
    %c0_2 = arith.constant 0 : index
    %c0_3 = arith.constant 0 : index
    %3 = vector.load %arg4[%c0_2, %c0_3] : memref<16x32xbf16, #tpu.memory_space<vmem>>, vector<16x32xbf16>
    %cst = arith.constant dense<0.000000e+00> : vector<16x32xf32>
    %4 = tpu.matmul %2, %3, %cst {dimension_numbers = #tpu.dot_dimension_numbers<[1], [0], [0], [1], [0, 0, 1, 1], [], []>} : vector<16x16xbf16>, vector<16x32xbf16>, vector<16x32xf32> -> vector<16x32xf32>
    %c0_4 = arith.constant 0 : index
    %c0_5 = arith.constant 0 : index
    %5 = vector.load %arg10[%c0_4, %c0_5] : memref<2x128xf32, #tpu.memory_space<vmem>>, vector<1x32xf32>
    %6 = vector.broadcast %5 : vector<1x32xf32> to vector<16x32xf32>
    %7 = arith.addf %4, %6 : vector<16x32xf32>
    %c0_6 = arith.constant 0 : index
    %c0_7 = arith.constant 0 : index
    %c0_8 = arith.constant 0 : index
    %8 = vector.load %arg1[%c0_6, %c0_7, %c0_8] : memref<1x1x32xf32, #tpu.memory_space<vmem>>, vector<1x1x32xf32>
    %9 = vector.shape_cast %8 : vector<1x1x32xf32> to vector<1x1x32xf32>
    %10 = vector.broadcast %9 : vector<1x1x32xf32> to vector<1x16x32xf32>
    %11 = vector.shape_cast %10 : vector<1x16x32xf32> to vector<16x32xf32>
    %c0_9 = arith.constant 0 : index
    %c0_10 = arith.constant 0 : index
    %12 = vector.load %arg3[%c0_9, %c0_10] : memref<16x32xf32, #tpu.memory_space<vmem>>, vector<16x32xf32>
    %13 = vector.shape_cast %12 : vector<16x32xf32> to vector<1x16x32xf32>
    %14 = vector.shape_cast %13 : vector<1x16x32xf32> to vector<16x32xf32>
    %15 = tpu.iota {dimensions = array<i32: 0>} : vector<16x32xi32>
    %c15_i32 = arith.constant 15 : i32
    %16 = vector.broadcast %c15_i32 : i32 to vector<16x32xi32>
    %17 = arith.andi %15, %16 : vector<16x32xi32>
    %c0_i32 = arith.constant 0 : i32
    %18 = vector.broadcast %c0_i32 : i32 to vector<16x32xi32>
    %19 = arith.cmpi eq, %17, %18 : vector<16x32xi32>
    %20 = arith.select %19, %11, %7 : vector<16x32xi1>, vector<16x32xf32>
    %21 = arith.addf %20, %14 : vector<16x32xf32>
    %22 = tpu.iota {dimensions = array<i32: 0>} : vector<16x16xi32>
    %23 = tpu.iota {dimensions = array<i32: 1>} : vector<16x16xi32>
    %c4_i32 = arith.constant 4 : i32
    %24 = vector.broadcast %c4_i32 : i32 to vector<16x16xi32>
    %25 = arith.shrsi %22, %24 : vector<16x16xi32>
    %c4_i32_11 = arith.constant 4 : i32
    %26 = vector.broadcast %c4_i32_11 : i32 to vector<16x16xi32>
    %27 = arith.shrsi %23, %26 : vector<16x16xi32>
    %28 = arith.cmpi eq, %25, %27 : vector<16x16xi32>
    %c15_i32_12 = arith.constant 15 : i32
    %29 = vector.broadcast %c15_i32_12 : i32 to vector<16x16xi32>
    %30 = arith.andi %23, %29 : vector<16x16xi32>
    %c9_i32 = arith.constant 9 : i32
    %31 = vector.broadcast %c9_i32 : i32 to vector<16x16xi32>
    %32 = arith.cmpi slt, %30, %31 : vector<16x16xi32>
    %33 = arith.andi %28, %32 : vector<16x16xi1>
    %c0_13 = arith.constant 0 : index
    %c0_14 = arith.constant 0 : index
    %c0_15 = arith.constant 0 : index
    %34 = vector.load %arg9[%c0_13, %c0_14, %c0_15] : memref<2x8x128xf32, #tpu.memory_space<vmem>>, vector<1x8x128xf32>
    %35 = vector.shape_cast %34 : vector<1x8x128xf32> to vector<8x128xf32>
    %36 = vector.extract_strided_slice %35 {offsets = [0, 0], sizes = [1, 96], strides = [1, 1]} : vector<8x128xf32> to vector<1x96xf32>
    %37 = vector.extract_strided_slice %35 {offsets = [1, 0], sizes = [1, 32], strides = [1, 1]} : vector<8x128xf32> to vector<1x32xf32>
    %38 = vector.extract_strided_slice %35 {offsets = [2, 0], sizes = [1, 32], strides = [1, 1]} : vector<8x128xf32> to vector<1x32xf32>
    %39 = vector.extract_strided_slice %35 {offsets = [3, 0], sizes = [1, 32], strides = [1, 1]} : vector<8x128xf32> to vector<1x32xf32>
    %40 = vector.extract_strided_slice %35 {offsets = [4, 0], sizes = [1, 128], strides = [1, 1]} : vector<8x128xf32> to vector<1x128xf32>
    %41 = vector.extract_strided_slice %35 {offsets = [5, 0], sizes = [1, 32], strides = [1, 1]} : vector<8x128xf32> to vector<1x32xf32>
    %42 = vector.extract_strided_slice %35 {offsets = [6, 0], sizes = [1, 32], strides = [1, 1]} : vector<8x128xf32> to vector<1x32xf32>
    %43 = vector.extract_strided_slice %35 {offsets = [7, 0], sizes = [1, 32], strides = [1, 1]} : vector<8x128xf32> to vector<1x32xf32>
    %44 = arith.truncf %21 : vector<16x32xf32> to vector<16x32xbf16>
    %c0_16 = arith.constant 0 : index
    %c0_17 = arith.constant 0 : index
    %c0_18 = arith.constant 0 : index
    %45 = vector.load %arg5[%c0_16, %c0_17, %c0_18] : memref<2x32x96xbf16, #tpu.memory_space<vmem>>, vector<1x32x96xbf16>
    %46 = vector.shape_cast %45 : vector<1x32x96xbf16> to vector<32x96xbf16>
    %cst_19 = arith.constant dense<0.000000e+00> : vector<16x96xf32>
    %47 = tpu.matmul %44, %46, %cst_19 {dimension_numbers = #tpu.dot_dimension_numbers<[1], [0], [0], [1], [0, 0, 1, 1], [], []>} : vector<16x32xbf16>, vector<32x96xbf16>, vector<16x96xf32> -> vector<16x96xf32>
    %48 = vector.broadcast %36 : vector<1x96xf32> to vector<16x96xf32>
    %49 = arith.addf %47, %48 : vector<16x96xf32>
    %50 = vector.extract_strided_slice %49 {offsets = [0, 0], sizes = [16, 16], strides = [1, 1]} : vector<16x96xf32> to vector<16x16xf32>
    %51 = vector.extract_strided_slice %49 {offsets = [0, 32], sizes = [16, 16], strides = [1, 1]} : vector<16x96xf32> to vector<16x16xf32>
    %52 = vector.extract_strided_slice %49 {offsets = [0, 64], sizes = [16, 16], strides = [1, 1]} : vector<16x96xf32> to vector<16x16xf32>
    %53 = arith.truncf %50 : vector<16x16xf32> to vector<16x16xbf16>
    %54 = arith.truncf %51 : vector<16x16xf32> to vector<16x16xbf16>
    %cst_20 = arith.constant dense<0.000000e+00> : vector<16x16xf32>
    %55 = tpu.matmul %53, %54, %cst_20 {dimension_numbers = #tpu.dot_dimension_numbers<[1], [1], [0], [0], [0, 0, 1, 0], [], []>} : vector<16x16xbf16>, vector<16x16xbf16>, vector<16x16xf32> -> vector<16x16xf32>
    %cst_21 = arith.constant 2.500000e-01 : f32
    %56 = vector.broadcast %cst_21 : f32 to vector<16x16xf32>
    %57 = arith.mulf %55, %56 : vector<16x16xf32>
    %cst_22 = arith.constant -1.000000e+30 : f32
    %58 = vector.broadcast %cst_22 : f32 to vector<16x16xf32>
    %59 = arith.select %33, %57, %58 : vector<16x16xi1>, vector<16x16xf32>
    %cst_23 = arith.constant dense<0xFF800000> : vector<16xf32>
    %60 = vector.multi_reduction <maximumf>, %59, %cst_23 [1] : vector<16x16xf32> to vector<16xf32>
    %61 = vector.shape_cast %60 : vector<16xf32> to vector<16x1xf32>
    %62 = vector.broadcast %61 : vector<16x1xf32> to vector<16x16xf32>
    %63 = arith.subf %59, %62 : vector<16x16xf32>
    %64 = math.exp %63 : vector<16x16xf32>
    %cst_24 = arith.constant dense<0.000000e+00> : vector<16xf32>
    %65 = vector.multi_reduction <add>, %64, %cst_24 [1] : vector<16x16xf32> to vector<16xf32>
    %66 = vector.shape_cast %65 : vector<16xf32> to vector<16x1xf32>
    %67 = tpu.reciprocal %66 {approx = true} : vector<16x1xf32> -> vector<16x1xf32>
    %68 = vector.broadcast %67 : vector<16x1xf32> to vector<16x16xf32>
    %69 = arith.mulf %64, %68 : vector<16x16xf32>
    %70 = arith.truncf %69 : vector<16x16xf32> to vector<16x16xbf16>
    %71 = arith.truncf %52 : vector<16x16xf32> to vector<16x16xbf16>
    %cst_25 = arith.constant dense<0.000000e+00> : vector<16x16xf32>
    %72 = tpu.matmul %70, %71, %cst_25 {dimension_numbers = #tpu.dot_dimension_numbers<[1], [0], [0], [1], [0, 0, 1, 1], [], []>} : vector<16x16xbf16>, vector<16x16xbf16>, vector<16x16xf32> -> vector<16x16xf32>
    %73 = vector.extract_strided_slice %49 {offsets = [0, 16], sizes = [16, 16], strides = [1, 1]} : vector<16x96xf32> to vector<16x16xf32>
    %74 = vector.extract_strided_slice %49 {offsets = [0, 48], sizes = [16, 16], strides = [1, 1]} : vector<16x96xf32> to vector<16x16xf32>
    %75 = vector.extract_strided_slice %49 {offsets = [0, 80], sizes = [16, 16], strides = [1, 1]} : vector<16x96xf32> to vector<16x16xf32>
    %76 = arith.truncf %73 : vector<16x16xf32> to vector<16x16xbf16>
    %77 = arith.truncf %74 : vector<16x16xf32> to vector<16x16xbf16>
    %cst_26 = arith.constant dense<0.000000e+00> : vector<16x16xf32>
    %78 = tpu.matmul %76, %77, %cst_26 {dimension_numbers = #tpu.dot_dimension_numbers<[1], [1], [0], [0], [0, 0, 1, 0], [], []>} : vector<16x16xbf16>, vector<16x16xbf16>, vector<16x16xf32> -> vector<16x16xf32>
    %cst_27 = arith.constant 2.500000e-01 : f32
    %79 = vector.broadcast %cst_27 : f32 to vector<16x16xf32>
    %80 = arith.mulf %78, %79 : vector<16x16xf32>
    %cst_28 = arith.constant -1.000000e+30 : f32
    %81 = vector.broadcast %cst_28 : f32 to vector<16x16xf32>
    %82 = arith.select %33, %80, %81 : vector<16x16xi1>, vector<16x16xf32>
    %cst_29 = arith.constant dense<0xFF800000> : vector<16xf32>
    %83 = vector.multi_reduction <maximumf>, %82, %cst_29 [1] : vector<16x16xf32> to vector<16xf32>
    %84 = vector.shape_cast %83 : vector<16xf32> to vector<16x1xf32>
    %85 = vector.broadcast %84 : vector<16x1xf32> to vector<16x16xf32>
    %86 = arith.subf %82, %85 : vector<16x16xf32>
    %87 = math.exp %86 : vector<16x16xf32>
    %cst_30 = arith.constant dense<0.000000e+00> : vector<16xf32>
    %88 = vector.multi_reduction <add>, %87, %cst_30 [1] : vector<16x16xf32> to vector<16xf32>
    %89 = vector.shape_cast %88 : vector<16xf32> to vector<16x1xf32>
    %90 = tpu.reciprocal %89 {approx = true} : vector<16x1xf32> -> vector<16x1xf32>
    %91 = vector.broadcast %90 : vector<16x1xf32> to vector<16x16xf32>
    %92 = arith.mulf %87, %91 : vector<16x16xf32>
    %93 = arith.truncf %92 : vector<16x16xf32> to vector<16x16xbf16>
    %94 = arith.truncf %75 : vector<16x16xf32> to vector<16x16xbf16>
    %cst_31 = arith.constant dense<0.000000e+00> : vector<16x16xf32>
    %95 = tpu.matmul %93, %94, %cst_31 {dimension_numbers = #tpu.dot_dimension_numbers<[1], [0], [0], [1], [0, 0, 1, 1], [], []>} : vector<16x16xbf16>, vector<16x16xbf16>, vector<16x16xf32> -> vector<16x16xf32>
    %96 = tpu.concatenate %72, %95 in 1 : vector<16x16xf32>, vector<16x16xf32> -> vector<16x32xf32>
    %97 = arith.truncf %96 : vector<16x32xf32> to vector<16x32xbf16>
    %c0_32 = arith.constant 0 : index
    %c0_33 = arith.constant 0 : index
    %c0_34 = arith.constant 0 : index
    %98 = vector.load %arg6[%c0_32, %c0_33, %c0_34] : memref<2x32x32xbf16, #tpu.memory_space<vmem>>, vector<1x32x32xbf16>
    %99 = vector.shape_cast %98 : vector<1x32x32xbf16> to vector<32x32xbf16>
    %cst_35 = arith.constant dense<0.000000e+00> : vector<16x32xf32>
    %100 = tpu.matmul %97, %99, %cst_35 {dimension_numbers = #tpu.dot_dimension_numbers<[1], [0], [0], [1], [0, 0, 1, 1], [], []>} : vector<16x32xbf16>, vector<32x32xbf16>, vector<16x32xf32> -> vector<16x32xf32>
    %101 = vector.broadcast %37 : vector<1x32xf32> to vector<16x32xf32>
    %102 = arith.addf %100, %101 : vector<16x32xf32>
    %103 = arith.addf %102, %21 : vector<16x32xf32>
    %cst_36 = arith.constant dense<0.000000e+00> : vector<16xf32>
    %104 = vector.multi_reduction <add>, %103, %cst_36 [1] : vector<16x32xf32> to vector<16xf32>
    %105 = vector.shape_cast %104 : vector<16xf32> to vector<16x1xf32>
    %cst_37 = arith.constant 3.200000e+01 : f32
    %106 = vector.broadcast %cst_37 : f32 to vector<16x1xf32>
    %107 = arith.divf %105, %106 : vector<16x1xf32>
    %108 = vector.broadcast %107 : vector<16x1xf32> to vector<16x32xf32>
    %109 = arith.subf %103, %108 : vector<16x32xf32>
    %110 = arith.mulf %109, %109 : vector<16x32xf32>
    %cst_38 = arith.constant dense<0.000000e+00> : vector<16xf32>
    %111 = vector.multi_reduction <add>, %110, %cst_38 [1] : vector<16x32xf32> to vector<16xf32>
    %112 = vector.shape_cast %111 : vector<16xf32> to vector<16x1xf32>
    %cst_39 = arith.constant 3.200000e+01 : f32
    %113 = vector.broadcast %cst_39 : f32 to vector<16x1xf32>
    %114 = arith.divf %112, %113 : vector<16x1xf32>
    %115 = vector.broadcast %107 : vector<16x1xf32> to vector<16x32xf32>
    %116 = arith.subf %103, %115 : vector<16x32xf32>
    %cst_40 = arith.constant 9.99999974E-6 : f32
    %117 = vector.broadcast %cst_40 : f32 to vector<16x1xf32>
    %118 = arith.addf %114, %117 : vector<16x1xf32>
    %119 = math.rsqrt %118 : vector<16x1xf32>
    %120 = vector.broadcast %119 : vector<16x1xf32> to vector<16x32xf32>
    %121 = arith.mulf %116, %120 : vector<16x32xf32>
    %122 = vector.broadcast %38 : vector<1x32xf32> to vector<16x32xf32>
    %123 = arith.mulf %121, %122 : vector<16x32xf32>
    %124 = vector.broadcast %39 : vector<1x32xf32> to vector<16x32xf32>
    %125 = arith.addf %123, %124 : vector<16x32xf32>
    %126 = arith.truncf %125 : vector<16x32xf32> to vector<16x32xbf16>
    %c0_41 = arith.constant 0 : index
    %c0_42 = arith.constant 0 : index
    %c0_43 = arith.constant 0 : index
    %127 = vector.load %arg7[%c0_41, %c0_42, %c0_43] : memref<2x32x128xbf16, #tpu.memory_space<vmem>>, vector<1x32x128xbf16>
    %128 = vector.shape_cast %127 : vector<1x32x128xbf16> to vector<32x128xbf16>
    %cst_44 = arith.constant dense<0.000000e+00> : vector<16x128xf32>
    %129 = tpu.matmul %126, %128, %cst_44 {dimension_numbers = #tpu.dot_dimension_numbers<[1], [0], [0], [1], [0, 0, 1, 1], [], []>} : vector<16x32xbf16>, vector<32x128xbf16>, vector<16x128xf32> -> vector<16x128xf32>
    %130 = vector.broadcast %40 : vector<1x128xf32> to vector<16x128xf32>
    %131 = arith.addf %129, %130 : vector<16x128xf32>
    %cst_45 = arith.constant 0.000000e+00 : f32
    %132 = vector.broadcast %cst_45 : f32 to vector<16x128xf32>
    %133 = arith.maximumf %131, %132 : vector<16x128xf32>
    %134 = arith.truncf %133 : vector<16x128xf32> to vector<16x128xbf16>
    %c0_46 = arith.constant 0 : index
    %c0_47 = arith.constant 0 : index
    %c0_48 = arith.constant 0 : index
    %135 = vector.load %arg8[%c0_46, %c0_47, %c0_48] : memref<2x128x32xbf16, #tpu.memory_space<vmem>>, vector<1x128x32xbf16>
    %136 = vector.shape_cast %135 : vector<1x128x32xbf16> to vector<128x32xbf16>
    %cst_49 = arith.constant dense<0.000000e+00> : vector<16x32xf32>
    %137 = tpu.matmul %134, %136, %cst_49 {dimension_numbers = #tpu.dot_dimension_numbers<[1], [0], [0], [1], [0, 0, 1, 1], [], []>} : vector<16x128xbf16>, vector<128x32xbf16>, vector<16x32xf32> -> vector<16x32xf32>
    %138 = vector.broadcast %41 : vector<1x32xf32> to vector<16x32xf32>
    %139 = arith.addf %137, %138 : vector<16x32xf32>
    %140 = arith.addf %139, %125 : vector<16x32xf32>
    %cst_50 = arith.constant dense<0.000000e+00> : vector<16xf32>
    %141 = vector.multi_reduction <add>, %140, %cst_50 [1] : vector<16x32xf32> to vector<16xf32>
    %142 = vector.shape_cast %141 : vector<16xf32> to vector<16x1xf32>
    %cst_51 = arith.constant 3.200000e+01 : f32
    %143 = vector.broadcast %cst_51 : f32 to vector<16x1xf32>
    %144 = arith.divf %142, %143 : vector<16x1xf32>
    %145 = vector.broadcast %144 : vector<16x1xf32> to vector<16x32xf32>
    %146 = arith.subf %140, %145 : vector<16x32xf32>
    %147 = arith.mulf %146, %146 : vector<16x32xf32>
    %cst_52 = arith.constant dense<0.000000e+00> : vector<16xf32>
    %148 = vector.multi_reduction <add>, %147, %cst_52 [1] : vector<16x32xf32> to vector<16xf32>
    %149 = vector.shape_cast %148 : vector<16xf32> to vector<16x1xf32>
    %cst_53 = arith.constant 3.200000e+01 : f32
    %150 = vector.broadcast %cst_53 : f32 to vector<16x1xf32>
    %151 = arith.divf %149, %150 : vector<16x1xf32>
    %152 = vector.broadcast %144 : vector<16x1xf32> to vector<16x32xf32>
    %153 = arith.subf %140, %152 : vector<16x32xf32>
    %cst_54 = arith.constant 9.99999974E-6 : f32
    %154 = vector.broadcast %cst_54 : f32 to vector<16x1xf32>
    %155 = arith.addf %151, %154 : vector<16x1xf32>
    %156 = math.rsqrt %155 : vector<16x1xf32>
    %157 = vector.broadcast %156 : vector<16x1xf32> to vector<16x32xf32>
    %158 = arith.mulf %153, %157 : vector<16x32xf32>
    %159 = vector.broadcast %42 : vector<1x32xf32> to vector<16x32xf32>
    %160 = arith.mulf %158, %159 : vector<16x32xf32>
    %161 = vector.broadcast %43 : vector<1x32xf32> to vector<16x32xf32>
    %162 = arith.addf %160, %161 : vector<16x32xf32>
    %c1 = arith.constant 1 : index
    %c0_55 = arith.constant 0 : index
    %c0_56 = arith.constant 0 : index
    %163 = vector.load %arg9[%c1, %c0_55, %c0_56] : memref<2x8x128xf32, #tpu.memory_space<vmem>>, vector<1x8x128xf32>
    %164 = vector.shape_cast %163 : vector<1x8x128xf32> to vector<8x128xf32>
    %165 = vector.extract_strided_slice %164 {offsets = [0, 0], sizes = [1, 96], strides = [1, 1]} : vector<8x128xf32> to vector<1x96xf32>
    %166 = vector.extract_strided_slice %164 {offsets = [1, 0], sizes = [1, 32], strides = [1, 1]} : vector<8x128xf32> to vector<1x32xf32>
    %167 = vector.extract_strided_slice %164 {offsets = [2, 0], sizes = [1, 32], strides = [1, 1]} : vector<8x128xf32> to vector<1x32xf32>
    %168 = vector.extract_strided_slice %164 {offsets = [3, 0], sizes = [1, 32], strides = [1, 1]} : vector<8x128xf32> to vector<1x32xf32>
    %169 = vector.extract_strided_slice %164 {offsets = [4, 0], sizes = [1, 128], strides = [1, 1]} : vector<8x128xf32> to vector<1x128xf32>
    %170 = vector.extract_strided_slice %164 {offsets = [5, 0], sizes = [1, 32], strides = [1, 1]} : vector<8x128xf32> to vector<1x32xf32>
    %171 = vector.extract_strided_slice %164 {offsets = [6, 0], sizes = [1, 32], strides = [1, 1]} : vector<8x128xf32> to vector<1x32xf32>
    %172 = vector.extract_strided_slice %164 {offsets = [7, 0], sizes = [1, 32], strides = [1, 1]} : vector<8x128xf32> to vector<1x32xf32>
    %173 = arith.truncf %162 : vector<16x32xf32> to vector<16x32xbf16>
    %c1_57 = arith.constant 1 : index
    %c0_58 = arith.constant 0 : index
    %c0_59 = arith.constant 0 : index
    %174 = vector.load %arg5[%c1_57, %c0_58, %c0_59] : memref<2x32x96xbf16, #tpu.memory_space<vmem>>, vector<1x32x96xbf16>
    %175 = vector.shape_cast %174 : vector<1x32x96xbf16> to vector<32x96xbf16>
    %cst_60 = arith.constant dense<0.000000e+00> : vector<16x96xf32>
    %176 = tpu.matmul %173, %175, %cst_60 {dimension_numbers = #tpu.dot_dimension_numbers<[1], [0], [0], [1], [0, 0, 1, 1], [], []>} : vector<16x32xbf16>, vector<32x96xbf16>, vector<16x96xf32> -> vector<16x96xf32>
    %177 = vector.broadcast %165 : vector<1x96xf32> to vector<16x96xf32>
    %178 = arith.addf %176, %177 : vector<16x96xf32>
    %179 = vector.extract_strided_slice %178 {offsets = [0, 0], sizes = [16, 16], strides = [1, 1]} : vector<16x96xf32> to vector<16x16xf32>
    %180 = vector.extract_strided_slice %178 {offsets = [0, 32], sizes = [16, 16], strides = [1, 1]} : vector<16x96xf32> to vector<16x16xf32>
    %181 = vector.extract_strided_slice %178 {offsets = [0, 64], sizes = [16, 16], strides = [1, 1]} : vector<16x96xf32> to vector<16x16xf32>
    %182 = arith.truncf %179 : vector<16x16xf32> to vector<16x16xbf16>
    %183 = arith.truncf %180 : vector<16x16xf32> to vector<16x16xbf16>
    %cst_61 = arith.constant dense<0.000000e+00> : vector<16x16xf32>
    %184 = tpu.matmul %182, %183, %cst_61 {dimension_numbers = #tpu.dot_dimension_numbers<[1], [1], [0], [0], [0, 0, 1, 0], [], []>} : vector<16x16xbf16>, vector<16x16xbf16>, vector<16x16xf32> -> vector<16x16xf32>
    %cst_62 = arith.constant 2.500000e-01 : f32
    %185 = vector.broadcast %cst_62 : f32 to vector<16x16xf32>
    %186 = arith.mulf %184, %185 : vector<16x16xf32>
    %cst_63 = arith.constant -1.000000e+30 : f32
    %187 = vector.broadcast %cst_63 : f32 to vector<16x16xf32>
    %188 = arith.select %33, %186, %187 : vector<16x16xi1>, vector<16x16xf32>
    %cst_64 = arith.constant dense<0xFF800000> : vector<16xf32>
    %189 = vector.multi_reduction <maximumf>, %188, %cst_64 [1] : vector<16x16xf32> to vector<16xf32>
    %190 = vector.shape_cast %189 : vector<16xf32> to vector<16x1xf32>
    %191 = vector.broadcast %190 : vector<16x1xf32> to vector<16x16xf32>
    %192 = arith.subf %188, %191 : vector<16x16xf32>
    %193 = math.exp %192 : vector<16x16xf32>
    %cst_65 = arith.constant dense<0.000000e+00> : vector<16xf32>
    %194 = vector.multi_reduction <add>, %193, %cst_65 [1] : vector<16x16xf32> to vector<16xf32>
    %195 = vector.shape_cast %194 : vector<16xf32> to vector<16x1xf32>
    %196 = tpu.reciprocal %195 {approx = true} : vector<16x1xf32> -> vector<16x1xf32>
    %197 = vector.broadcast %196 : vector<16x1xf32> to vector<16x16xf32>
    %198 = arith.mulf %193, %197 : vector<16x16xf32>
    %199 = arith.truncf %198 : vector<16x16xf32> to vector<16x16xbf16>
    %200 = arith.truncf %181 : vector<16x16xf32> to vector<16x16xbf16>
    %cst_66 = arith.constant dense<0.000000e+00> : vector<16x16xf32>
    %201 = tpu.matmul %199, %200, %cst_66 {dimension_numbers = #tpu.dot_dimension_numbers<[1], [0], [0], [1], [0, 0, 1, 1], [], []>} : vector<16x16xbf16>, vector<16x16xbf16>, vector<16x16xf32> -> vector<16x16xf32>
    %202 = vector.extract_strided_slice %178 {offsets = [0, 16], sizes = [16, 16], strides = [1, 1]} : vector<16x96xf32> to vector<16x16xf32>
    %203 = vector.extract_strided_slice %178 {offsets = [0, 48], sizes = [16, 16], strides = [1, 1]} : vector<16x96xf32> to vector<16x16xf32>
    %204 = vector.extract_strided_slice %178 {offsets = [0, 80], sizes = [16, 16], strides = [1, 1]} : vector<16x96xf32> to vector<16x16xf32>
    %205 = arith.truncf %202 : vector<16x16xf32> to vector<16x16xbf16>
    %206 = arith.truncf %203 : vector<16x16xf32> to vector<16x16xbf16>
    %cst_67 = arith.constant dense<0.000000e+00> : vector<16x16xf32>
    %207 = tpu.matmul %205, %206, %cst_67 {dimension_numbers = #tpu.dot_dimension_numbers<[1], [1], [0], [0], [0, 0, 1, 0], [], []>} : vector<16x16xbf16>, vector<16x16xbf16>, vector<16x16xf32> -> vector<16x16xf32>
    %cst_68 = arith.constant 2.500000e-01 : f32
    %208 = vector.broadcast %cst_68 : f32 to vector<16x16xf32>
    %209 = arith.mulf %207, %208 : vector<16x16xf32>
    %cst_69 = arith.constant -1.000000e+30 : f32
    %210 = vector.broadcast %cst_69 : f32 to vector<16x16xf32>
    %211 = arith.select %33, %209, %210 : vector<16x16xi1>, vector<16x16xf32>
    %cst_70 = arith.constant dense<0xFF800000> : vector<16xf32>
    %212 = vector.multi_reduction <maximumf>, %211, %cst_70 [1] : vector<16x16xf32> to vector<16xf32>
    %213 = vector.shape_cast %212 : vector<16xf32> to vector<16x1xf32>
    %214 = vector.broadcast %213 : vector<16x1xf32> to vector<16x16xf32>
    %215 = arith.subf %211, %214 : vector<16x16xf32>
    %216 = math.exp %215 : vector<16x16xf32>
    %cst_71 = arith.constant dense<0.000000e+00> : vector<16xf32>
    %217 = vector.multi_reduction <add>, %216, %cst_71 [1] : vector<16x16xf32> to vector<16xf32>
    %218 = vector.shape_cast %217 : vector<16xf32> to vector<16x1xf32>
    %219 = tpu.reciprocal %218 {approx = true} : vector<16x1xf32> -> vector<16x1xf32>
    %220 = vector.broadcast %219 : vector<16x1xf32> to vector<16x16xf32>
    %221 = arith.mulf %216, %220 : vector<16x16xf32>
    %222 = arith.truncf %221 : vector<16x16xf32> to vector<16x16xbf16>
    %223 = arith.truncf %204 : vector<16x16xf32> to vector<16x16xbf16>
    %cst_72 = arith.constant dense<0.000000e+00> : vector<16x16xf32>
    %224 = tpu.matmul %222, %223, %cst_72 {dimension_numbers = #tpu.dot_dimension_numbers<[1], [0], [0], [1], [0, 0, 1, 1], [], []>} : vector<16x16xbf16>, vector<16x16xbf16>, vector<16x16xf32> -> vector<16x16xf32>
    %225 = tpu.concatenate %201, %224 in 1 : vector<16x16xf32>, vector<16x16xf32> -> vector<16x32xf32>
    %226 = arith.truncf %225 : vector<16x32xf32> to vector<16x32xbf16>
    %c1_73 = arith.constant 1 : index
    %c0_74 = arith.constant 0 : index
    %c0_75 = arith.constant 0 : index
    %227 = vector.load %arg6[%c1_73, %c0_74, %c0_75] : memref<2x32x32xbf16, #tpu.memory_space<vmem>>, vector<1x32x32xbf16>
    %228 = vector.shape_cast %227 : vector<1x32x32xbf16> to vector<32x32xbf16>
    %cst_76 = arith.constant dense<0.000000e+00> : vector<16x32xf32>
    %229 = tpu.matmul %226, %228, %cst_76 {dimension_numbers = #tpu.dot_dimension_numbers<[1], [0], [0], [1], [0, 0, 1, 1], [], []>} : vector<16x32xbf16>, vector<32x32xbf16>, vector<16x32xf32> -> vector<16x32xf32>
    %230 = vector.broadcast %166 : vector<1x32xf32> to vector<16x32xf32>
    %231 = arith.addf %229, %230 : vector<16x32xf32>
    %232 = arith.addf %231, %162 : vector<16x32xf32>
    %cst_77 = arith.constant dense<0.000000e+00> : vector<16xf32>
    %233 = vector.multi_reduction <add>, %232, %cst_77 [1] : vector<16x32xf32> to vector<16xf32>
    %234 = vector.shape_cast %233 : vector<16xf32> to vector<16x1xf32>
    %cst_78 = arith.constant 3.200000e+01 : f32
    %235 = vector.broadcast %cst_78 : f32 to vector<16x1xf32>
    %236 = arith.divf %234, %235 : vector<16x1xf32>
    %237 = vector.broadcast %236 : vector<16x1xf32> to vector<16x32xf32>
    %238 = arith.subf %232, %237 : vector<16x32xf32>
    %239 = arith.mulf %238, %238 : vector<16x32xf32>
    %cst_79 = arith.constant dense<0.000000e+00> : vector<16xf32>
    %240 = vector.multi_reduction <add>, %239, %cst_79 [1] : vector<16x32xf32> to vector<16xf32>
    %241 = vector.shape_cast %240 : vector<16xf32> to vector<16x1xf32>
    %cst_80 = arith.constant 3.200000e+01 : f32
    %242 = vector.broadcast %cst_80 : f32 to vector<16x1xf32>
    %243 = arith.divf %241, %242 : vector<16x1xf32>
    %244 = vector.broadcast %236 : vector<16x1xf32> to vector<16x32xf32>
    %245 = arith.subf %232, %244 : vector<16x32xf32>
    %cst_81 = arith.constant 9.99999974E-6 : f32
    %246 = vector.broadcast %cst_81 : f32 to vector<16x1xf32>
    %247 = arith.addf %243, %246 : vector<16x1xf32>
    %248 = math.rsqrt %247 : vector<16x1xf32>
    %249 = vector.broadcast %248 : vector<16x1xf32> to vector<16x32xf32>
    %250 = arith.mulf %245, %249 : vector<16x32xf32>
    %251 = vector.broadcast %167 : vector<1x32xf32> to vector<16x32xf32>
    %252 = arith.mulf %250, %251 : vector<16x32xf32>
    %253 = vector.broadcast %168 : vector<1x32xf32> to vector<16x32xf32>
    %254 = arith.addf %252, %253 : vector<16x32xf32>
    %255 = arith.truncf %254 : vector<16x32xf32> to vector<16x32xbf16>
    %c1_82 = arith.constant 1 : index
    %c0_83 = arith.constant 0 : index
    %c0_84 = arith.constant 0 : index
    %256 = vector.load %arg7[%c1_82, %c0_83, %c0_84] : memref<2x32x128xbf16, #tpu.memory_space<vmem>>, vector<1x32x128xbf16>
    %257 = vector.shape_cast %256 : vector<1x32x128xbf16> to vector<32x128xbf16>
    %cst_85 = arith.constant dense<0.000000e+00> : vector<16x128xf32>
    %258 = tpu.matmul %255, %257, %cst_85 {dimension_numbers = #tpu.dot_dimension_numbers<[1], [0], [0], [1], [0, 0, 1, 1], [], []>} : vector<16x32xbf16>, vector<32x128xbf16>, vector<16x128xf32> -> vector<16x128xf32>
    %259 = vector.broadcast %169 : vector<1x128xf32> to vector<16x128xf32>
    %260 = arith.addf %258, %259 : vector<16x128xf32>
    %cst_86 = arith.constant 0.000000e+00 : f32
    %261 = vector.broadcast %cst_86 : f32 to vector<16x128xf32>
    %262 = arith.maximumf %260, %261 : vector<16x128xf32>
    %263 = arith.truncf %262 : vector<16x128xf32> to vector<16x128xbf16>
    %c1_87 = arith.constant 1 : index
    %c0_88 = arith.constant 0 : index
    %c0_89 = arith.constant 0 : index
    %264 = vector.load %arg8[%c1_87, %c0_88, %c0_89] : memref<2x128x32xbf16, #tpu.memory_space<vmem>>, vector<1x128x32xbf16>
    %265 = vector.shape_cast %264 : vector<1x128x32xbf16> to vector<128x32xbf16>
    %cst_90 = arith.constant dense<0.000000e+00> : vector<16x32xf32>
    %266 = tpu.matmul %263, %265, %cst_90 {dimension_numbers = #tpu.dot_dimension_numbers<[1], [0], [0], [1], [0, 0, 1, 1], [], []>} : vector<16x128xbf16>, vector<128x32xbf16>, vector<16x32xf32> -> vector<16x32xf32>
    %267 = vector.broadcast %170 : vector<1x32xf32> to vector<16x32xf32>
    %268 = arith.addf %266, %267 : vector<16x32xf32>
    %269 = arith.addf %268, %254 : vector<16x32xf32>
    %cst_91 = arith.constant dense<0.000000e+00> : vector<16xf32>
    %270 = vector.multi_reduction <add>, %269, %cst_91 [1] : vector<16x32xf32> to vector<16xf32>
    %271 = vector.shape_cast %270 : vector<16xf32> to vector<16x1xf32>
    %cst_92 = arith.constant 3.200000e+01 : f32
    %272 = vector.broadcast %cst_92 : f32 to vector<16x1xf32>
    %273 = arith.divf %271, %272 : vector<16x1xf32>
    %274 = vector.broadcast %273 : vector<16x1xf32> to vector<16x32xf32>
    %275 = arith.subf %269, %274 : vector<16x32xf32>
    %276 = arith.mulf %275, %275 : vector<16x32xf32>
    %cst_93 = arith.constant dense<0.000000e+00> : vector<16xf32>
    %277 = vector.multi_reduction <add>, %276, %cst_93 [1] : vector<16x32xf32> to vector<16xf32>
    %278 = vector.shape_cast %277 : vector<16xf32> to vector<16x1xf32>
    %cst_94 = arith.constant 3.200000e+01 : f32
    %279 = vector.broadcast %cst_94 : f32 to vector<16x1xf32>
    %280 = arith.divf %278, %279 : vector<16x1xf32>
    %281 = vector.broadcast %273 : vector<16x1xf32> to vector<16x32xf32>
    %282 = arith.subf %269, %281 : vector<16x32xf32>
    %cst_95 = arith.constant 9.99999974E-6 : f32
    %283 = vector.broadcast %cst_95 : f32 to vector<16x1xf32>
    %284 = arith.addf %280, %283 : vector<16x1xf32>
    %285 = math.rsqrt %284 : vector<16x1xf32>
    %286 = vector.broadcast %285 : vector<16x1xf32> to vector<16x32xf32>
    %287 = arith.mulf %282, %286 : vector<16x32xf32>
    %288 = vector.broadcast %171 : vector<1x32xf32> to vector<16x32xf32>
    %289 = arith.mulf %287, %288 : vector<16x32xf32>
    %290 = vector.broadcast %172 : vector<1x32xf32> to vector<16x32xf32>
    %291 = arith.addf %289, %290 : vector<16x32xf32>
    %292 = arith.truncf %291 : vector<16x32xf32> to vector<16x32xbf16>
    %c0_96 = arith.constant 0 : index
    %c0_97 = arith.constant 0 : index
    %293 = vector.load %arg11[%c0_96, %c0_97] : memref<32x128xbf16, #tpu.memory_space<vmem>>, vector<32x128xbf16>
    %cst_98 = arith.constant dense<0.000000e+00> : vector<16x128xf32>
    %294 = tpu.matmul %292, %293, %cst_98 {dimension_numbers = #tpu.dot_dimension_numbers<[1], [0], [0], [1], [0, 0, 1, 1], [], []>} : vector<16x32xbf16>, vector<32x128xbf16>, vector<16x128xf32> -> vector<16x128xf32>
    %c1_99 = arith.constant 1 : index
    %c0_100 = arith.constant 0 : index
    %295 = vector.load %arg10[%c1_99, %c0_100] : memref<2x128xf32, #tpu.memory_space<vmem>>, vector<1x128xf32>
    %296 = vector.broadcast %295 : vector<1x128xf32> to vector<16x128xf32>
    %297 = arith.addf %294, %296 : vector<16x128xf32>
    %298 = vector.shape_cast %297 : vector<16x128xf32> to vector<1x16x128xf32>
    %c0_101 = arith.constant 0 : index
    %c0_102 = arith.constant 0 : index
    %c0_103 = arith.constant 0 : index
    %299 = vector.load %arg12[%c0_101, %c0_102, %c0_103] : memref<1x16x128xf32, #tpu.memory_space<vmem>>, vector<1x16x128xf32>
    tpu.vector_store %arg12[%c0_101, %c0_102, %c0_103], %298 {strides = array<i32>} : memref<1x16x128xf32, #tpu.memory_space<vmem>>, vector<1x16x128xf32>,
    return
  }
  func.func @transform_0(%arg0: i32) -> (i32, i32, i32) {
    %c0_i32 = arith.constant 0 : i32
    %c0_i32_0 = arith.constant 0 : i32
    %c0_i32_1 = arith.constant 0 : i32
    return %arg0, %c0_i32, %c0_i32_0 : i32, i32, i32
  }
  func.func @transform_1(%arg0: i32) -> (i32, i32, i32) {
    %c0_i32 = arith.constant 0 : i32
    %c0_i32_0 = arith.constant 0 : i32
    %c0_i32_1 = arith.constant 0 : i32
    return %arg0, %c0_i32, %c0_i32_0 : i32, i32, i32
  }
  func.func @transform_2(%arg0: i32) -> (i32, i32) {
    %c0_i32 = arith.constant 0 : i32
    %c0_i32_0 = arith.constant 0 : i32
    %c0_i32_1 = arith.constant 0 : i32
    return %c0_i32, %c0_i32_0 : i32, i32
  }
  func.func @transform_3(%arg0: i32) -> (i32, i32) {
    %c0_i32 = arith.constant 0 : i32
    %c0_i32_0 = arith.constant 0 : i32
    %c0_i32_1 = arith.constant 0 : i32
    return %c0_i32, %c0_i32_0 : i32, i32
  }
  func.func @transform_4(%arg0: i32) -> (i32, i32, i32) {
    %c0_i32 = arith.constant 0 : i32
    %c0_i32_0 = arith.constant 0 : i32
    %c0_i32_1 = arith.constant 0 : i32
    %c0_i32_2 = arith.constant 0 : i32
    return %c0_i32, %c0_i32_0, %c0_i32_1 : i32, i32, i32
  }
  func.func @transform_5(%arg0: i32) -> (i32, i32, i32) {
    %c0_i32 = arith.constant 0 : i32
    %c0_i32_0 = arith.constant 0 : i32
    %c0_i32_1 = arith.constant 0 : i32
    %c0_i32_2 = arith.constant 0 : i32
    return %c0_i32, %c0_i32_0, %c0_i32_1 : i32, i32, i32
  }
  func.func @transform_6(%arg0: i32) -> (i32, i32, i32) {
    %c0_i32 = arith.constant 0 : i32
    %c0_i32_0 = arith.constant 0 : i32
    %c0_i32_1 = arith.constant 0 : i32
    %c0_i32_2 = arith.constant 0 : i32
    return %c0_i32, %c0_i32_0, %c0_i32_1 : i32, i32, i32
  }
  func.func @transform_7(%arg0: i32) -> (i32, i32, i32) {
    %c0_i32 = arith.constant 0 : i32
    %c0_i32_0 = arith.constant 0 : i32
    %c0_i32_1 = arith.constant 0 : i32
    %c0_i32_2 = arith.constant 0 : i32
    return %c0_i32, %c0_i32_0, %c0_i32_1 : i32, i32, i32
  }
  func.func @transform_8(%arg0: i32) -> (i32, i32, i32) {
    %c0_i32 = arith.constant 0 : i32
    %c0_i32_0 = arith.constant 0 : i32
    %c0_i32_1 = arith.constant 0 : i32
    %c0_i32_2 = arith.constant 0 : i32
    return %c0_i32, %c0_i32_0, %c0_i32_1 : i32, i32, i32
  }
  func.func @transform_9(%arg0: i32) -> (i32, i32) {
    %c0_i32 = arith.constant 0 : i32
    %c0_i32_0 = arith.constant 0 : i32
    %c0_i32_1 = arith.constant 0 : i32
    return %c0_i32, %c0_i32_0 : i32, i32
  }
  func.func @transform_10(%arg0: i32) -> (i32, i32) {
    %c0_i32 = arith.constant 0 : i32
    %c0_i32_0 = arith.constant 0 : i32
    %c0_i32_1 = arith.constant 0 : i32
    return %c0_i32, %c0_i32_0 : i32, i32
  }
  func.func @transform_11(%arg0: i32) -> (i32, i32, i32) {
    %c0_i32 = arith.constant 0 : i32
    %c0_i32_0 = arith.constant 0 : i32
    %c0_i32_1 = arith.constant 0 : i32
    return %arg0, %c0_i32, %c0_i32_0 : i32, i32, i32
  }
}

</mosaic_0001>

<bundles_post_ra>
// kernel: transformer_diffusion_forward.1
= control target key start
LH: loop header
LB: loop body
LE: loop exit
PB: predicated region body
PF: predicated region fallthrough
CT: control target
= control target key end

     0   :  { %s2409_s17 = smov 0   ;;  %s2812_s0 = inlined_call_operand.vmem [shape: f32[2,1,32], index: 0, kind: input, shape index: {}]   ;;  %s2813_s1 = inlined_call_operand.vmem [shape: f32[2,16,16], index: 1, kind: input, shape index: {}]   ;;  %s2814_s2 = inlined_call_operand.vmem [shape: f32[16,32], index: 2, kind: input, shape index: {}]   ;;  %s2815_s3 = inlined_call_operand.vmem [shape: bf16[16,32], index: 3, kind: input, shape index: {}]   ;;  %s2816_s4 = inlined_call_operand.vmem [shape: bf16[2,32,96], index: 4, kind: input, shape index: {}]   ;;  %s2817_s5 = inlined_call_operand.vmem [shape: bf16[2,32,32], index: 5, kind: input, shape index: {}]   ;;  %s2818_s6 = inlined_call_operand.vmem [shape: bf16[2,32,128], index: 6, kind: input, shape index: {}]   ;;  %s2819_s7 = inlined_call_operand.vmem [shape: bf16[2,128,32], index: 7, kind: input, shape index: {}]   ;;  %s2820_s8 = inlined_call_operand.vmem [shape: f32[2,8,128], index: 8, kind: input, shape index: {}]   ;;  %s2821_s9 = inlined_call_operand.vmem [shape: f32[2,128], index: 9, kind: input, shape index: {}]   ;;  %s2822_s10 = inlined_call_operand.vmem [shape: bf16[32,128], index: 10, kind: input, shape index: {}]   ;;  %s2823_s11 = inlined_call_operand.vmem [shape: f32[2,16,128], index: 11, kind: output, shape index: {}]  }
   0x1 LB: > { %s1929_s18 = sadd.s32 4294967295, %s2339_s17   ;;  %p1933_p0 = scmp.ge.s32.totalorder %s2339_s17, 1  ;;  %s2339_s17 = sphi %s2409_s17, %s21_s17  }
   0x2   : > { %p345_p1 = scmp.lt.s32.totalorder %s2339_s17, 3 }
   0x4   : > { %p346_p2 = pnand %p1933_p0, %p345_p1 }
   0x5   : > { %p388_p3 = scmp.lt.s32.totalorder (!%p346_p2), %s1929_s18, 1  ;;  %s2344_s25 = smov (!%p346_p2), 96  }
   0x6   : > { %349 = sbr.rel (%p346_p2) target bundleno = 5714 (0x1652), region = 64  ;;  %s2345_s26 = smov (!%p346_p2), 80  }
   0x7   : > { %s2346_s27 = smov (!%p346_p2), 48   ;;  %s2347_s28 = smov (!%p346_p2), 64  }
   0x8   : > { %s2348_s14 = smov (!%p346_p2), 16  }
   0xb   : > { %v2254_v0 = vld [vmem:[%s2815_s3] sm:$0xff]   ;;  %v2341_v1 = vmov 0.0   ;;  %vm2342_vm0 = vmmov 0   ;;  %s2829_s18 = smov (!%p388_p3, %s1929_s18), 1  ;;  %vm418_vm1 = vcmask 130048   ;;  %v2255_v5 = vld [vmem:[%s2816_s4 + $0x8] sm:$0xff]   ;;  %v472_v7 = vlaneseq }
   0xc   : > { %2078 = vmatprep.subr.bf16.mxu0 %v2341_v1  ;;  %2098 = vmatprep.subr.bf16.mxu1 %v2341_v1  ;;  %s2019_s21 = sshll.u32 %s2829_s18, 4  ;;  %v2256_v6 = vld [vmem:[%s2816_s4] sm:$0xff]   ;;  %s390_s12 = scalar_lea.vmem %s2812_s0, %s2829_s18  ;;  %v471_v18 = vld [vmem:[%s2814_s2 + $0x8] sm:$0xff]  ;;  %vm516_vm3 = vcmask 261120  }
   0xd   : > { %2079 = vmatpush3.bf16.msra.mxu0 %v2254_v0  ;;  %2080 = vmatprep.mubr.msk.bf16.mxu0 %vm2342_vm0, %v2341_v1  ;;  %s395_s24 = scalar_lea.vmem %s2813_s1, %s2019_s21  ;;  %v2446_v8 = vshrl.u32 %v472_v7, 7  ;;  %v1938_v10 = vld [vmem:[%s2821_s9] ss:$0 sm:$0xff]  ;;  %v484_v39 = vand.u32 127, %v472_v7 }
   0xe   : > { %2084 = vmatprep.subr.bf16.mxu0 %v2341_v1  ;;  %2100 = vmatprep.mubr.msk.bf16.mxu1 %vm2342_vm0, %v2341_v1  ;;  %v402_v2 = vld [vmem:[%s395_s24] sm:$0xff]  ;;  %v403_v3 = vld [vmem:[%s395_s24 + $0x8] sm:$0xff]  ;;  %s2343_s24 = smov 112  }
   0xf   : > { %v404_v4 = vpack.c.bf16 %v403_v3, %v402_v2  ;;  %v475_v9 = vand.u32 15, %v2446_v8  ;;  %v1941_v13 = vld [vmem:[%s390_s12] ss:$0 sm:$0xff]  ;;  %v502_v24 = vsub.s32 0, %v2446_v8  ;;  %v485_v40 = vshra.s32 %v2446_v8, 4 }
  0x10   : > { %v470_v15 = vld [vmem:[%s2814_s2] sm:$0xff]  ;;  %v487_v41 = vshra.s32 %v484_v39, 4  ;;  %v490_v42 = vand.u32 15, %v484_v39  ;;  %v474_v43 = vadd.s32 8, %v2446_v8 }
  0x11   : > { %2081 = vmatmul.mubr.msk.bf16.vlgmr.msra.gmra.mxu0 %vm418_vm1, %v404_v4  ;;  %vm477_vm2 = vcmp.eq.s32.totalorder %v475_v9, 0  ;;  %v2475_v25 = vld [vmem:[%s2820_s8] sm:$0xff] }
  0x12   : > { %2088 = vmatprep.mubr.msk.bf16.mxu0 %vm2342_vm0, %v2341_v1  ;;  %2085 = vmatpush3.bf16.msra.mxu0 %v2255_v5  ;;  %v503_v27 = vrot.slane %v2475_v25, %v502_v24  ;;  %vm488_vm4 = vcmp.eq.s32.totalorder %v485_v40, %v487_v41  ;;  %vm491_vm5 = vcmp.lt.s32.totalorder %v490_v42, 9  ;;  %v486_v44 = vshra.s32 %v474_v43, 4 }
  0x13   : > { %2086 = vmatprep.subr.bf16.mxu0 %v2341_v1  ;;  %vm2501_vm6 = vmand %vm488_vm4, %vm491_vm5 }
  0x14   : > { %vm489_vm7 = vcmp.eq.s32.totalorder %v486_v44, %v487_v41 }
  0x15   : > { %vm2508_vm8 = vmand %vm489_vm7, %vm491_vm5 }
  0x16   : > { %2087 = vmatpush3.bf16.msra.mxu0 %v2256_v6 }
  0x17   : > { %2092 = vmatprep.subr.bf16.mxu0 %v2341_v1 }
  0xd1   : > { %v456_v11 = vpop.f32.mrf.mxu0 }
  0xd2   : > { %v457_v12 = vadd.f32 %v1938_v10, %v456_v11 }
  0xd3   : > { %v2082_v14 = vpop.f32.mrf.mxu0 }
  0xd4   : > { %v479_v16 = vsel %vm477_vm2, %v1941_v13, %v457_v12 }
  0xd5   : > { %v459_v17 = vpop.f32.mrf.mxu0  ;;  %v2462_v21 = vadd.f32 %v479_v16, %v470_v15 }
  0xd6   : > { %v460_v19 = vadd.f32 %v1938_v10, %v459_v17 }
  0xd7   : > { %v2083_v20 = vpop.f32.mrf.mxu0 }
  0xd8   : > { %v2464_v22 = vadd.f32 %v471_v18, %v460_v19 }
  0xda   : > { %v495_v23 = vpack.c.bf16 %v2464_v22, %v2462_v21 }
  0xdc   : > { %2089 = vmatmul.mubr.msk.bf16.vlgmr.msra.gmra.mxu0 %vm516_vm3, %v495_v23 }
  0xdd   : > { %2094 = vmatprep.mubr.msk.bf16.mxu0 %vm2342_vm0, %v2341_v1 }
 0x19c   : > { %v554_v26 = vpop.f32.mrf.mxu0 }
 0x19d   : > { %v555_v30 = vadd.f32 %v554_v26, %v503_v27 }
 0x19e   : > { %v2090_v28 = vpop.f32.mrf.mxu0 }
 0x1a0   : > { %v557_v29 = vpop.f32.mrf.mxu0 }
 0x1a1   : > { %v558_v31 = vadd.f32 %v557_v29, %v503_v27 }
 0x1a2   : > { %v2091_v32 = vpop.f32.mrf.mxu0 }
 0x1a3   : > { %v2480_v33 = vpack.c.bf16 %v558_v31, %v555_v30 }
 0x1a5   : > { %686 = vrot.lane.b32.xlu1 %v2480_v33, %s2343_s24  ;;  %563 = vrot.lane.b32.xlu0 %v2480_v33, %s2344_s25 }
 0x1a9   : > { %688 = vrot.lane.b32.xlu0 %v2480_v33, %s2345_s26 }
 0x217   : > { %v564_v34 = vpop.permute.xlu0 %563  ;;  %v687_v38 = vpop.permute.xlu1 %686 }
 0x218   : > { %v569_v35 = vsel %vm418_vm1, %v564_v34, 0 }
 0x219   : > { %2093 = vmatpush3.bf16.xpose.msra.mxu0 %v569_v35 }
 0x21a   : > { %2104 = vmatprep.subr.bf16.mxu0 %v2341_v1 }
 0x21b   : > { %v689_v36 = vpop.permute.xlu0 %688 }
 0x21c   : > { %v694_v37 = vsel %vm418_vm1, %v689_v36, 0 }
 0x220   : > { %2095 = vmatmul.mubr.msk.bf16.vlgmr.msra.gmra.mxu0 %vm418_vm1, %v2480_v33 }
 0x221   : > { %2105 = vmatpush3.bf16.xpose.msra.mxu0 %v694_v37  ;;  %2106 = vmatprep.mubr.msk.bf16.mxu0 %vm2342_vm0, %v2341_v1 }
 0x222   : > { %2116 = vmatprep.subr.bf16.mxu0 %v2341_v1 }
 0x228   : > { %2107 = vmatmul.mubr.msk.bf16.vlgmr.msra.gmra.mxu0 %vm418_vm1, %v687_v38 }
 0x229   : > { %2120 = vmatprep.mubr.msk.bf16.mxu0 %vm2342_vm0, %v2341_v1 }
 0x2e0   : > { %v605_v45 = vpop.f32.mrf.mxu0 }
 0x2e1   : > { %v612_v47 = vmul.f32 0.25, %v605_v45  ;;  %v2257_v45 = vld [vmem:[%s2817_s5 + $0x8] sm:$0xff]  }
 0x2e2   : > { %v2096_v48 = vpop.f32.mrf.mxu0  ;;  %2117 = vmatpush3.bf16.msra.mxu0 %v2257_v45 }
 0x2e3   : > { %v614_v49 = vsel %vm2501_vm6, %v612_v47, -1e+30  ;;  %2118 = vmatprep.subr.bf16.mxu0 %v2341_v1 }
 0x2e4   : > { %v608_v50 = vpop.f32.mrf.mxu0  ;;  %v616_v51 = vsel %vm418_vm1, %v614_v49, -inf }
 0x2e5   : > { %v613_v53 = vmul.f32 0.25, %v608_v50  ;;  %617 = vmax.xlane.f32.xlu1 %v616_v51 }
 0x2e6   : > { %v2097_v54 = vpop.f32.mrf.mxu0 }
 0x2e7   : > { %v615_v55 = vsel %vm2508_vm8, %v613_v53, -1e+30 }
 0x2e8   : > { %v730_v56 = vpop.f32.mrf.mxu0  ;;  %v619_v57 = vsel %vm418_vm1, %v615_v55, -inf }
 0x2e9   : > { %v737_v58 = vmul.f32 0.25, %v730_v56  ;;  %620 = vmax.xlane.f32.xlu0 %v619_v57 }
 0x2ea   : > { %v2108_v59 = vpop.f32.mrf.mxu0 }
 0x2eb   : > { %v739_v60 = vsel %vm2501_vm6, %v737_v58, -1e+30 }
 0x2ec   : > { %v733_v61 = vpop.f32.mrf.mxu0  ;;  %v741_v62 = vsel %vm418_vm1, %v739_v60, -inf }
 0x2ed   : > { %v738_v63 = vmul.f32 0.25, %v733_v61  ;;  %742 = vmax.xlane.f32.xlu0 %v741_v62 }
 0x2ee   : > { %v2109_v0 = vpop.f32.mrf.mxu0 }
 0x2ef   : > { %v740_v2 = vsel %vm2508_vm8, %v738_v63, -1e+30  ;;  %v828_v0 = vsub.s32 1, %v2446_v8 }
 0x2f0   : > { %v744_v3 = vsel %vm418_vm1, %v740_v2, -inf }
 0x2f1   : > { %745 = vmax.xlane.f32.xlu1 %v744_v3 }
 0x36e   : > { %v618_v4 = vpop.xlane.xlu1 %617 }
 0x36f   : > { %v622_v5 = vsub.f32 %v614_v49, %v618_v4  ;;  %v2258_v49 = vld [vmem:[%s2817_s5] sm:$0xff]  }
 0x370   : > { %2119 = vmatpush3.bf16.msra.mxu0 %v2258_v49 }
 0x371   : > { %v624_v6 = vmul.f32 1.442695, %v622_v5  ;;  %2132 = vmatprep.subr.bf16.mxu0 %v2341_v1 }
 0x372   : > { %v621_v7 = vpop.xlane.xlu0 %620 }
 0x373   : > { %2285 = vpow2.f32 %v624_v6  ;;  %v623_v9 = vsub.f32 %v615_v55, %v621_v7 }
 0x375   : > { %v626_v10 = vmul.f32 1.442695, %v623_v9 }
 0x376   : > { %v743_v11 = vpop.xlane.xlu0 %742 }
 0x377   : > { %2287 = vpow2.f32 %v626_v10  ;;  %v747_v12 = vsub.f32 %v739_v60, %v743_v11 }
 0x379   : > { %v749_v13 = vmul.f32 1.442695, %v747_v12 }
 0x37a   : > { %v746_v14 = vpop.xlane.xlu1 %745 }
 0x37b   : > { %2289 = vpow2.f32 %v749_v13  ;;  %v748_v15 = vsub.f32 %v740_v2, %v746_v14  ;;  %v829_v2 = vrot.slane %v2475_v25, %v828_v0 }
 0x37d   : > { %v751_v16 = vmul.f32 1.442695, %v748_v15 }
 0x37f   : > { %2291 = vpow2.f32 %v751_v16 }
 0x380   : > { %v2286_v17 = vpop.eup %2285 }
 0x381   : > { %v628_v18 = vsel %vm418_vm1, %v2286_v17, 0.0 }
 0x382   : > { %629 = vadd.xlane.f32.xlu0 %v628_v18 }
 0x384   : > { %v2288_v19 = vpop.eup %2287 }
 0x385   : > { %v631_v20 = vsel %vm418_vm1, %v2288_v19, 0.0 }
 0x386   : > { %632 = vadd.xlane.f32.xlu1 %v631_v20 }
 0x388   : > { %v2290_v23 = vpop.eup %2289 }
 0x389   : > { %v753_v26 = vsel %vm418_vm1, %v2290_v23, 0.0 }
 0x38a   : > { %754 = vadd.xlane.f32.xlu0 %v753_v26 }
 0x38c   : > { %v2292_v27 = vpop.eup %2291 }
 0x38d   : > { %v756_v28 = vsel %vm418_vm1, %v2292_v27, 0.0 }
 0x38e   : > { %757 = vadd.xlane.f32.xlu1 %v756_v28  ;;  %v2261_v28 = vld [vmem:[%s2819_s7 + $0x38] sm:$0xff]  }
 0x39f   : > { %764 = vrot.lane.b32.xlu1 %v2480_v33, %s2346_s27 }
 0x3a0   : > { %639 = vrot.lane.b32.xlu0 %v2480_v33, %s2347_s28 }
 0x40b   : > { %v630_v29 = vpop.xlane.xlu0 %629 }
 0x40c   : > { %2293 = vrcp.f32 %v630_v29  ;;  %v2262_v29 = vld [vmem:[%s2819_s7 + $0x30] sm:$0xff]  }
 0x40f   : > { %v633_v30 = vpop.xlane.xlu1 %632 }
 0x410   : > { %2295 = vrcp.f32 %v633_v30  ;;  %v2263_v30 = vld [vmem:[%s2819_s7 + $0x28] sm:$0xff]  }
 0x413   : > { %v755_v31 = vpop.xlane.xlu0 %754 }
 0x414   : > { %2297 = vrcp.f32 %v755_v31  ;;  %v2264_v31 = vld [vmem:[%s2819_s7 + $0x20] sm:$0xff]  }
 0x417   : > { %v640_v32 = vpop.permute.xlu0 %639  ;;  %v758_v34 = vpop.xlane.xlu1 %757 }
 0x418   : > { %2299 = vrcp.f32 %v758_v34  ;;  %2099 = vmatpush3.bf16.msra.mxu1 %v640_v32  ;;  %v2265_v32 = vld [vmem:[%s2819_s7 + $0x18] sm:$0xff]  }
 0x419   : > { %2110 = vmatprep.subr.bf16.mxu1 %v2341_v1  ;;  %v2294_v35 = vpop.eup %2293 }
 0x41a   : > { %v636_v37 = vmul.f32 %v2294_v35, %v2286_v17 }
 0x41b   : > { %v765_v40 = vpop.permute.xlu1 %764 }
 0x41d   : > { %v2296_v36 = vpop.eup %2295 }
 0x41e   : > { %v637_v38 = vmul.f32 %v2296_v36, %v2288_v19 }
 0x420   : > { %v638_v39 = vpack.c.bf16 %v637_v38, %v636_v37 }
 0x421   : > { %v2298_v33 = vpop.eup %2297 }
 0x422   : > { %2101 = vmatmul.mubr.msk.bf16.vlgmr.msra.gmra.mxu1 %vm418_vm1, %v638_v39  ;;  %v761_v42 = vmul.f32 %v2298_v33, %v2290_v23 }
 0x423   : > { %2111 = vmatpush3.bf16.msra.mxu1 %v765_v40  ;;  %2112 = vmatprep.mubr.msk.bf16.mxu1 %vm2342_vm0, %v2341_v1  ;;  %v917_v40 = vsub.s32 2, %v2446_v8 }
 0x424   : > { %2124 = vmatprep.subr.bf16.mxu1 %v2341_v1 }
 0x425   : > { %v2300_v41 = vpop.eup %2299 }
 0x426   : > { %v762_v43 = vmul.f32 %v2300_v41, %v2292_v27  ;;  %v2260_v27 = vld [vmem:[%s2818_s6] sm:$0xff]  }
 0x428   : > { %v763_v44 = vpack.c.bf16 %v762_v43, %v761_v42  ;;  %v918_v42 = vrot.slane %v2475_v25, %v917_v40  ;;  %v923_v43 = vsub.s32 3, %v2446_v8 }
 0x42a   : > { %2113 = vmatmul.mubr.msk.bf16.vlgmr.msra.gmra.mxu1 %vm418_vm1, %v763_v44 }
 0x42b   : > { %2128 = vmatprep.mubr.msk.bf16.mxu1 %vm2342_vm0, %v2341_v1 }
 0x4e2   : > { %v679_v47 = vpop.f32.mrf.mxu1 }
 0x4e4   : > { %v2102_v48 = vpop.f32.mrf.mxu1 }
 0x4e5   : > { %v924_v48 = vrot.slane %v2475_v25, %v923_v43 }
 0x4e6   : > { %v682_v50 = vpop.f32.mrf.mxu1 }
 0x4e8   : > { %v2103_v51 = vpop.f32.mrf.mxu1 }
 0x4ea   : > { %v804_v53 = vpop.f32.mrf.mxu1 }
 0x4ec   : > { %v2114_v54 = vpop.f32.mrf.mxu1 }
 0x4ed   : > { %v2266_v54 = vld [vmem:[%s2819_s7 + $0x10] sm:$0xff]  }
 0x4ee   : > { %v807_v55 = vpop.f32.mrf.mxu1 }
 0x4ef   : > { %v2244_v56 = vpack.i.bf16 %v807_v55, %v804_v53  ;;  %v2267_v55 = vld [vmem:[%s2819_s7 + $0x8] sm:$0xff]  }
 0x4f0   : > { %v2115_v57 = vpop.f32.mrf.mxu1 }
 0x4f1   : > { %2245 = vrot.lane.b32.xlu1 %v2244_v56, %s2348_s14  ;;  %v2268_v56 = vld [vmem:[%s2819_s7] sm:$0xff]   ;;  %v934_v57 = vsub.s32 4, %v2446_v8 }
 0x563   : > { %v2246_v58 = vpop.permute.xlu1 %2245 }
 0x564   : > { %v2248_v59 = vunpack.i.h.bf16 %v2246_v58  ;;  %v2247_v60 = vunpack.i.l.bf16 %v2246_v58  ;;  %v935_v58 = vrot.slane %v2475_v25, %v934_v57 }
 0x566   : > { %v820_v61 = vsel %vm418_vm1, %v682_v50, %v2248_v59  ;;  %v819_v62 = vsel %vm418_vm1, %v679_v47, %v2247_v60 }
 0x567   : > { %v821_v63 = vpack.c.bf16 %v820_v61, %v819_v62 }
 0x569   : > { %2121 = vmatmul.mubr.msk.bf16.vlgmr.msra.gmra.mxu0 %vm516_vm3, %v821_v63 }
 0x56a   : > { %2148 = vmatprep.mubr.msk.bf16.mxu0 %vm2342_vm0, %v2341_v1  ;;  %2133 = vmatpush3.bf16.msra.mxu0 %v2261_v28 }
 0x56b   : > { %2134 = vmatprep.subr.bf16.mxu0 %v2341_v1 }
 0x56e   : > { %2135 = vmatpush3.bf16.msra.mxu0 %v2262_v29 }
 0x56f   : > { %2136 = vmatprep.subr.bf16.mxu0 %v2341_v1 }
 0x572   : > { %2137 = vmatpush3.bf16.msra.mxu0 %v2263_v30 }
 0x573   : > { %2138 = vmatprep.subr.bf16.mxu0 %v2341_v1 }
 0x576   : > { %2139 = vmatpush3.bf16.msra.mxu0 %v2264_v31  ;;  %v2269_v31 = vld [vmem:[%s2816_s4 + $0x18] sm:$0xff]  }
 0x577   : > { %2140 = vmatprep.subr.bf16.mxu0 %v2341_v1 }
 0x57a   : > { %2141 = vmatpush3.bf16.msra.mxu0 %v2265_v32  ;;  %v2270_v32 = vld [vmem:[%s2816_s4 + $0x10] sm:$0xff]  }
 0x57b   : > { %2142 = vmatprep.subr.bf16.mxu0 %v2341_v1 }
 0x57e   : > { %2143 = vmatpush3.bf16.msra.mxu0 %v2266_v54 }
 0x57f   : > { %2144 = vmatprep.subr.bf16.mxu0 %v2341_v1 }
 0x582   : > { %2145 = vmatpush3.bf16.msra.mxu0 %v2267_v55 }
 0x583   : > { %2146 = vmatprep.subr.bf16.mxu0 %v2341_v1 }
 0x586   : > { %2147 = vmatpush3.bf16.msra.mxu0 %v2268_v56  ;;  %v2654_v56 = vld [vmem:[%s2820_s8 + $0x8] sm:$0xff] }
 0x587   : > { %2178 = vmatprep.subr.bf16.mxu0 %v2341_v1 }
 0x629   : > { %v879_v3 = vpop.f32.mrf.mxu0 }
 0x62a   : > { %v880_v4 = vadd.f32 %v879_v3, %v829_v2 }
 0x62b   : > { %v2122_v5 = vpop.f32.mrf.mxu0 }
 0x62c   : > { %v886_v6 = vadd.f32 %v880_v4, %v2462_v21 }
 0x62d   : > { %v882_v7 = vpop.f32.mrf.mxu0 }
 0x62e   : > { %v883_v9 = vadd.f32 %v882_v7, %v829_v2  ;;  %v888_v10 = vsel %vm516_vm3, %v886_v6, 0.0 }
 0x62f   : > { %889 = vadd.xlane.f32.xlu0 %v888_v10  ;;  %v2123_v11 = vpop.f32.mrf.mxu0 }
 0x630   : > { %v887_v12 = vadd.f32 %v883_v9, %v2464_v22  ;;  %v2259_v22 = vld [vmem:[%s2818_s6 + $0x8] sm:$0xff]  }
 0x631   : > { %2125 = vmatpush3.bf16.msra.mxu1 %v2259_v22 }
 0x632   : > { %v891_v13 = vsel %vm516_vm3, %v887_v12, 0.0  ;;  %2126 = vmatprep.subr.bf16.mxu1 %v2341_v1 }
 0x633   : > { %892 = vadd.xlane.f32.xlu1 %v891_v13 }
 0x635   : > { %2127 = vmatpush3.bf16.msra.mxu1 %v2260_v27 }
 0x636   : > { %2152 = vmatprep.subr.bf16.mxu1 %v2341_v1 }
 0x6b8   : > { %v890_v14 = vpop.xlane.xlu0 %889 }
 0x6b9   : > { %v895_v15 = vmul.f32 0.03125, %v890_v14 }
 0x6bb   : > { %v897_v16 = vsub.f32 %v886_v6, %v895_v15  ;;  %v1013_v6 = vsub.s32 5, %v2446_v8 }
 0x6bc   : > { %v893_v17 = vpop.xlane.xlu1 %892 }
 0x6bd   : > { %v896_v18 = vmul.f32 0.03125, %v893_v17  ;;  %v899_v19 = vmul.f32 %v897_v16, %v897_v16  ;;  %v1014_v7 = vrot.slane %v2475_v25, %v1013_v6 }
 0x6bf   : > { %v898_v20 = vsub.f32 %v887_v12, %v896_v18  ;;  %v901_v21 = vsel %vm516_vm3, %v899_v19, 0.0 }
 0x6c0   : > { %902 = vadd.xlane.f32.xlu0 %v901_v21 }
 0x6c1   : > { %v900_v23 = vmul.f32 %v898_v20, %v898_v20 }
 0x6c3   : > { %v904_v26 = vsel %vm516_vm3, %v900_v23, 0.0 }
 0x6c4   : > { %905 = vadd.xlane.f32.xlu0 %v904_v26 }
 0x749   : > { %v903_v34 = vpop.xlane.xlu0 %902 }
 0x74a   : > { %v907_v35 = vmul.f32 0.03125, %v903_v34 }
 0x74c   : > { %v909_v36 = vadd.f32 1e-05, %v907_v35 }
 0x74d   : > { %v906_v37 = vpop.xlane.xlu0 %905 }
 0x74e   : > { %2301 = vrsqrt.f32 %v909_v36  ;;  %v908_v38 = vmul.f32 0.03125, %v906_v37 }
 0x750   : > { %v910_v39 = vadd.f32 1e-05, %v908_v38 }
 0x752   : > { %2303 = vrsqrt.f32 %v910_v39 }
 0x75b   : > { %v2302_v33 = vpop.eup %2301 }
 0x75c   : > { %v913_v41 = vmul.f32 %v2302_v33, %v897_v16  ;;  %v1134_v33 = vsub.s32 6, %v2446_v8 }
 0x75e   : > { %v919_v47 = vmul.f32 %v918_v42, %v913_v41 }
 0x75f   : > { %v2304_v44 = vpop.eup %2303 }
 0x760   : > { %v914_v45 = vmul.f32 %v2304_v44, %v898_v20  ;;  %v925_v50 = vadd.f32 %v924_v48, %v919_v47  ;;  %v1135_v44 = vrot.slane %v2475_v25, %v1134_v33 }
 0x762   : > { %v920_v49 = vmul.f32 %v918_v42, %v914_v45  ;;  %v1140_v45 = vsub.s32 7, %v2446_v8 }
 0x764   : > { %v926_v51 = vadd.f32 %v924_v48, %v920_v49 }
 0x766   : > { %v927_v53 = vpack.c.bf16 %v926_v51, %v925_v50 }
 0x768   : > { %2129 = vmatmul.mubr.msk.bf16.vlgmr.msra.gmra.mxu1 %vm516_vm3, %v927_v53 }
 0x769   : > { %2156 = vmatprep.mubr.msk.bf16.mxu1 %vm2342_vm0, %v2341_v1  ;;  %2153 = vmatpush3.bf16.msra.mxu1 %v2269_v31 }
 0x76a   : > { %2154 = vmatprep.subr.bf16.mxu1 %v2341_v1 }
 0x76d   : > { %2155 = vmatpush3.bf16.msra.mxu1 %v2270_v32 }
 0x76e   : > { %2160 = vmatprep.subr.bf16.mxu1 %v2341_v1 }
 0x828   : > { %v985_v59 = vpop.f32.mrf.mxu1 }
 0x829   : > { %v986_v61 = vadd.f32 %v985_v59, %v935_v58 }
 0x82a   : > { %v2130_v60 = vpop.f32.mrf.mxu1 }
 0x82b   : > { %v992_v3 = vmax.f32 %v986_v61, 0.0 }
 0x82c   : > { %v988_v62 = vpop.f32.mrf.mxu1 }
 0x82d   : > { %v989_v63 = vadd.f32 %v988_v62, %v935_v58 }
 0x82e   : > { %v2131_v2 = vpop.f32.mrf.mxu1 }
 0x82f   : > { %v993_v4 = vmax.f32 %v989_v63, 0.0 }
 0x831   : > { %v994_v5 = vpack.c.bf16 %v993_v4, %v992_v3 }
 0x833   : > { %2149 = vmatmul.mubr.bf16.vlgmr.msra.gmra.mxu0 %v994_v5 }
 0x834   : > { %2180 = vmatprep.mubr.msk.bf16.mxu0 %vm2342_vm0, %v2341_v1 }
 0x8f3   : > { %v1097_v9 = vpop.f32.mrf.mxu0 }
 0x8f4   : > { %v1098_v10 = vadd.f32 %v1097_v9, %v1014_v7 }
 0x8f5   : > { %v2150_v11 = vpop.f32.mrf.mxu0 }
 0x8f6   : > { %v1104_v12 = vadd.f32 %v1098_v10, %v925_v50  ;;  %v1141_v50 = vrot.slane %v2475_v25, %v1140_v45  ;;  %v1155_v25 = vrot.slane %v2654_v56, %v502_v24 }
 0x8f7   : > { %v1100_v13 = vpop.f32.mrf.mxu0 }
 0x8f8   : > { %v1101_v14 = vadd.f32 %v1100_v13, %v1014_v7  ;;  %v1106_v15 = vsel %vm516_vm3, %v1104_v12, 0.0 }
 0x8f9   : > { %1107 = vadd.xlane.f32.xlu1 %v1106_v15  ;;  %v2151_v16 = vpop.f32.mrf.mxu0 }
 0x8fa   : > { %v1105_v17 = vadd.f32 %v1101_v14, %v926_v51 }
 0x8fc   : > { %v1109_v18 = vsel %vm516_vm3, %v1105_v17, 0.0 }
 0x8fd   : > { %1110 = vadd.xlane.f32.xlu0 %v1109_v18 }
 0x982   : > { %v1108_v19 = vpop.xlane.xlu1 %1107 }
 0x983   : > { %v1112_v20 = vmul.f32 0.03125, %v1108_v19 }
 0x985   : > { %v1114_v21 = vsub.f32 %v1104_v12, %v1112_v20 }
 0x986   : > { %v1111_v23 = vpop.xlane.xlu0 %1110 }
 0x987   : > { %v1113_v26 = vmul.f32 0.03125, %v1111_v23  ;;  %v1116_v22 = vmul.f32 %v1114_v21, %v1114_v21 }
 0x989   : > { %v1115_v27 = vsub.f32 %v1105_v17, %v1113_v26  ;;  %v1118_v28 = vsel %vm516_vm3, %v1116_v22, 0.0 }
 0x98a   : > { %1119 = vadd.xlane.f32.xlu1 %v1118_v28 }
 0x98b   : > { %v1117_v29 = vmul.f32 %v1115_v27, %v1115_v27 }
 0x98d   : > { %v1121_v30 = vsel %vm516_vm3, %v1117_v29, 0.0 }
 0x98e   : > { %1122 = vadd.xlane.f32.xlu0 %v1121_v30 }
 0xa13   : > { %v1120_v34 = vpop.xlane.xlu1 %1119 }
 0xa14   : > { %v1124_v35 = vmul.f32 0.03125, %v1120_v34 }
 0xa16   : > { %v1126_v36 = vadd.f32 1e-05, %v1124_v35 }
 0xa17   : > { %v1123_v37 = vpop.xlane.xlu0 %1122 }
 0xa18   : > { %2305 = vrsqrt.f32 %v1126_v36  ;;  %v1125_v38 = vmul.f32 0.03125, %v1123_v37 }
 0xa1a   : > { %v1127_v39 = vadd.f32 1e-05, %v1125_v38 }
 0xa1c   : > { %2307 = vrsqrt.f32 %v1127_v39 }
 0xa25   : > { %v2306_v41 = vpop.eup %2305 }
 0xa26   : > { %v1130_v42 = vmul.f32 %v2306_v41, %v1114_v21 }
 0xa28   : > { %v1136_v49 = vmul.f32 %v1135_v44, %v1130_v42 }
 0xa29   : > { %v2308_v47 = vpop.eup %2307 }
 0xa2a   : > { %v1131_v48 = vmul.f32 %v2308_v47, %v1115_v27  ;;  %v2642_v53 = vadd.f32 %v1141_v50, %v1136_v49 }
 0xa2c   : > { %v1137_v51 = vmul.f32 %v1135_v44, %v1131_v48 }
 0xa2e   : > { %v2644_v54 = vadd.f32 %v1141_v50, %v1137_v51 }
 0xa30   : > { %v1146_v55 = vpack.c.bf16 %v2644_v54, %v2642_v53 }
 0xa32   : > { %2157 = vmatmul.mubr.msk.bf16.vlgmr.msra.gmra.mxu1 %vm516_vm3, %v1146_v55 }
 0xa33   : > { %2162 = vmatprep.mubr.msk.bf16.mxu1 %vm2342_vm0, %v2341_v1 }
 0xaf2   : > { %v1205_v58 = vpop.f32.mrf.mxu1 }
 0xaf3   : > { %v1206_v61 = vadd.f32 %v1205_v58, %v1155_v25 }
 0xaf4   : > { %v2158_v59 = vpop.f32.mrf.mxu1 }
 0xaf6   : > { %v1208_v60 = vpop.f32.mrf.mxu1 }
 0xaf7   : > { %v1209_v62 = vadd.f32 %v1208_v60, %v1155_v25 }
 0xaf8   : > { %v2159_v63 = vpop.f32.mrf.mxu1 }
 0xaf9   : > { %v2659_v2 = vpack.c.bf16 %v1209_v62, %v1206_v61 }
 0xafb   : > { %1214 = vrot.lane.b32.xlu1 %v2659_v2, %s2344_s25 }
 0xaff   : > { %1290 = vrot.lane.b32.xlu1 %v2659_v2, %s2347_s28 }
 0xb03   : > { %1337 = vrot.lane.b32.xlu1 %v2659_v2, %s2343_s24  ;;  %s400_s24 = scalar_lea.vmem %s2823_s11, %s2019_s21 }
 0xb6d   : > { %v1215_v3 = vpop.permute.xlu1 %1214 }
 0xb6e   : > { %v1220_v4 = vsel %vm418_vm1, %v1215_v3, 0 }
 0xb6f   : > { %2161 = vmatpush3.bf16.xpose.msra.mxu1 %v1220_v4 }
 0xb70   : > { %2166 = vmatprep.subr.bf16.mxu1 %v2341_v1 }
 0xb71   : > { %v1291_v24 = vpop.permute.xlu1 %1290 }
 0xb75   : > { %v1338_v39 = vpop.permute.xlu1 %1337 }
 0xb76   : > { %2163 = vmatmul.mubr.msk.bf16.vlgmr.msra.gmra.mxu1 %vm418_vm1, %v2659_v2 }
 0xb77   : > { %2167 = vmatpush3.bf16.msra.mxu1 %v1291_v24  ;;  %2168 = vmatprep.mubr.msk.bf16.mxu1 %vm2342_vm0, %v2341_v1 }
 0xb78   : > { %2172 = vmatprep.subr.bf16.mxu1 %v2341_v1 }
 0xc36   : > { %v1256_v5 = vpop.f32.mrf.mxu1 }
 0xc37   : > { %v1263_v7 = vmul.f32 0.25, %v1256_v5 }
 0xc38   : > { %v2164_v9 = vpop.f32.mrf.mxu1 }
 0xc39   : > { %v1265_v10 = vsel %vm2501_vm6, %v1263_v7, -1e+30 }
 0xc3a   : > { %v1259_v11 = vpop.f32.mrf.mxu1  ;;  %v1267_v12 = vsel %vm418_vm1, %v1265_v10, -inf }
 0xc3b   : > { %v1264_v13 = vmul.f32 0.25, %v1259_v11  ;;  %1268 = vmax.xlane.f32.xlu0 %v1267_v12 }
 0xc3c   : > { %v2165_v14 = vpop.f32.mrf.mxu1 }
 0xc3d   : > { %v1266_v15 = vsel %vm2508_vm8, %v1264_v13, -1e+30 }
 0xc3e   : > { %v1270_v16 = vsel %vm418_vm1, %v1266_v15, -inf }
 0xc3f   : > { %1271 = vmax.xlane.f32.xlu0 %v1270_v16 }
 0xcc4   : > { %v1269_v17 = vpop.xlane.xlu0 %1268 }
 0xcc5   : > { %v1273_v18 = vsub.f32 %v1265_v10, %v1269_v17 }
 0xcc7   : > { %v1275_v19 = vmul.f32 1.442695, %v1273_v18  ;;  %v2272_v18 = vld [vmem:[%s2817_s5 + $0x10] sm:$0xff]  }
 0xcc8   : > { %v1272_v20 = vpop.xlane.xlu0 %1271 }
 0xcc9   : > { %2309 = vpow2.f32 %v1275_v19  ;;  %v1274_v21 = vsub.f32 %v1266_v15, %v1272_v20 }
 0xccb   : > { %v1277_v23 = vmul.f32 1.442695, %v1274_v21 }
 0xccd   : > { %2311 = vpow2.f32 %v1277_v23 }
 0xcd6   : > { %v2310_v26 = vpop.eup %2309 }
 0xcd7   : > { %v1279_v22 = vsel %vm418_vm1, %v2310_v26, 0.0 }
 0xcd8   : > { %1280 = vadd.xlane.f32.xlu0 %v1279_v22 }
 0xcda   : > { %v2312_v27 = vpop.eup %2311 }
 0xcdb   : > { %v1282_v28 = vsel %vm418_vm1, %v2312_v27, 0.0 }
 0xcdc   : > { %1283 = vadd.xlane.f32.xlu0 %v1282_v28 }
 0xcf2   : > { %1339 = vrot.lane.b32.xlu0 %v2659_v2, %s2345_s26 }
 0xd61   : > { %v1281_v29 = vpop.xlane.xlu0 %1280 }
 0xd62   : > { %2313 = vrcp.f32 %v1281_v29 }
 0xd65   : > { %v1284_v30 = vpop.xlane.xlu0 %1283 }
 0xd66   : > { %2315 = vrcp.f32 %v1284_v30 }
 0xd69   : > { %v1340_v36 = vpop.permute.xlu0 %1339 }
 0xd6a   : > { %v1345_v38 = vsel %vm418_vm1, %v1340_v36, 0 }
 0xd6f   : > { %v2314_v31 = vpop.eup %2313 }
 0xd70   : > { %v1287_v34 = vmul.f32 %v2314_v31, %v2310_v26 }
 0xd73   : > { %v2316_v32 = vpop.eup %2315 }
 0xd74   : > { %v1288_v35 = vmul.f32 %v2316_v32, %v2312_v27  ;;  %v1481_v32 = vrot.slane %v2654_v56, %v828_v0 }
 0xd76   : > { %v1289_v37 = vpack.c.bf16 %v1288_v35, %v1287_v34 }
 0xd78   : > { %2169 = vmatmul.mubr.msk.bf16.vlgmr.msra.gmra.mxu1 %vm418_vm1, %v1289_v37 }
 0xd79   : > { %2173 = vmatpush3.bf16.xpose.msra.mxu1 %v1345_v38  ;;  %2174 = vmatprep.mubr.msk.bf16.mxu1 %vm2342_vm0, %v2341_v1 }
 0xd7a   : > { %2184 = vmatprep.subr.bf16.mxu1 %v2341_v1 }
 0xd80   : > { %2175 = vmatmul.mubr.msk.bf16.vlgmr.msra.gmra.mxu1 %vm418_vm1, %v1338_v39 }
 0xd81   : > { %2188 = vmatprep.mubr.msk.bf16.mxu1 %vm2342_vm0, %v2341_v1 }
 0xe38   : > { %v1330_v41 = vpop.f32.mrf.mxu1 }
 0xe3a   : > { %v2170_v42 = vpop.f32.mrf.mxu1 }
 0xe3c   : > { %v1333_v44 = vpop.f32.mrf.mxu1 }
 0xe3e   : > { %v2171_v47 = vpop.f32.mrf.mxu1 }
 0xe40   : > { %v1381_v48 = vpop.f32.mrf.mxu1 }
 0xe41   : > { %v1388_v49 = vmul.f32 0.25, %v1381_v48 }
 0xe42   : > { %v2176_v50 = vpop.f32.mrf.mxu1 }
 0xe43   : > { %v1390_v51 = vsel %vm2501_vm6, %v1388_v49, -1e+30 }
 0xe44   : > { %v1384_v55 = vpop.f32.mrf.mxu1  ;;  %v1392_v58 = vsel %vm418_vm1, %v1390_v51, -inf }
 0xe45   : > { %v1389_v25 = vmul.f32 0.25, %v1384_v55  ;;  %1393 = vmax.xlane.f32.xlu1 %v1392_v58 }
 0xe46   : > { %v2177_v59 = vpop.f32.mrf.mxu1 }
 0xe47   : > { %v1391_v60 = vsel %vm2508_vm8, %v1389_v25, -1e+30 }
 0xe48   : > { %v1395_v61 = vsel %vm418_vm1, %v1391_v60, -inf }
 0xe49   : > { %1396 = vmax.xlane.f32.xlu0 %v1395_v61  ;;  %v2275_v61 = vld [vmem:[%s2819_s7 + $0x78] sm:$0xff]  }
 0xece   : > { %v1394_v62 = vpop.xlane.xlu1 %1393 }
 0xecf   : > { %v1398_v63 = vsub.f32 %v1390_v51, %v1394_v62  ;;  %v2276_v62 = vld [vmem:[%s2819_s7 + $0x70] sm:$0xff]  }
 0xed1   : > { %v1400_v3 = vmul.f32 1.442695, %v1398_v63  ;;  %v2277_v63 = vld [vmem:[%s2819_s7 + $0x68] sm:$0xff]  }
 0xed2   : > { %v1397_v4 = vpop.xlane.xlu0 %1396 }
 0xed3   : > { %2317 = vpow2.f32 %v1400_v3  ;;  %v1399_v24 = vsub.f32 %v1391_v60, %v1397_v4  ;;  %v2274_v60 = vld [vmem:[%s2818_s6 + $0x10] sm:$0xff]   ;;  %v2278_v3 = vld [vmem:[%s2819_s7 + $0x60] sm:$0xff]   ;;  %v2279_v4 = vld [vmem:[%s2819_s7 + $0x58] sm:$0xff]  }
 0xed5   : > { %v1402_v46 = vmul.f32 1.442695, %v1399_v24 }
 0xed7   : > { %2319 = vpow2.f32 %v1402_v46 }
 0xee0   : > { %v2318_v5 = vpop.eup %2317 }
 0xee1   : > { %v1404_v7 = vsel %vm418_vm1, %v2318_v5, 0.0 }
 0xee2   : > { %1405 = vadd.xlane.f32.xlu1 %v1404_v7 }
 0xee4   : > { %v2320_v9 = vpop.eup %2319 }
 0xee5   : > { %v1407_v10 = vsel %vm418_vm1, %v2320_v9, 0.0 }
 0xee6   : > { %1408 = vadd.xlane.f32.xlu1 %v1407_v10 }
 0xef7   : > { %1415 = vrot.lane.b32.xlu1 %v2659_v2, %s2346_s27  ;;  %v2271_v2 = vld [vmem:[%s2817_s5 + $0x18] sm:$0xff]  }
 0xef8   : > { %2185 = vmatpush3.bf16.msra.mxu1 %v2271_v2 }
 0xef9   : > { %2186 = vmatprep.subr.bf16.mxu1 %v2341_v1 }
 0xefc   : > { %2187 = vmatpush3.bf16.msra.mxu1 %v2272_v18 }
 0xefd   : > { %2200 = vmatprep.subr.bf16.mxu1 %v2341_v1 }
 0xf6b   : > { %v1406_v52 = vpop.xlane.xlu1 %1405 }
 0xf6c   : > { %2321 = vrcp.f32 %v1406_v52 }
 0xf6f   : > { %v1409_v11 = vpop.xlane.xlu1 %1408 }
 0xf70   : > { %2323 = vrcp.f32 %v1409_v11 }
 0xf73   : > { %v1416_v12 = vpop.permute.xlu1 %1415 }
 0xf74   : > { %2179 = vmatpush3.bf16.msra.mxu0 %v1416_v12  ;;  %v1569_v12 = vrot.slane %v2654_v56, %v917_v40  ;;  %v2280_v40 = vld [vmem:[%s2819_s7 + $0x50] sm:$0xff]  }
 0xf75   : > { %2192 = vmatprep.subr.bf16.mxu0 %v2341_v1 }
 0xf79   : > { %v2322_v13 = vpop.eup %2321 }
 0xf7a   : > { %v1412_v15 = vmul.f32 %v2322_v13, %v2318_v5 }
 0xf7d   : > { %v2324_v14 = vpop.eup %2323 }
 0xf7e   : > { %v1413_v16 = vmul.f32 %v2324_v14, %v2320_v9 }
 0xf80   : > { %v1414_v17 = vpack.c.bf16 %v1413_v16, %v1412_v15  ;;  %v1575_v16 = vrot.slane %v2654_v56, %v923_v43  ;;  %v2281_v43 = vld [vmem:[%s2819_s7 + $0x48] sm:$0xff]  }
 0xf82   : > { %2181 = vmatmul.mubr.msk.bf16.vlgmr.msra.gmra.mxu0 %vm418_vm1, %v1414_v17 }
 0xf83   : > { %2196 = vmatprep.mubr.msk.bf16.mxu0 %vm2342_vm0, %v2341_v1 }
0x1042   : > { %v1455_v19 = vpop.f32.mrf.mxu0 }
0x1044   : > { %v2182_v20 = vpop.f32.mrf.mxu0 }
0x1045   : > { %v2282_v20 = vld [vmem:[%s2819_s7 + $0x40] sm:$0xff]  }
0x1046   : > { %v1458_v21 = vpop.f32.mrf.mxu0 }
0x1047   : > { %v2249_v23 = vpack.i.bf16 %v1458_v21, %v1455_v19  ;;  %v1587_v21 = vrot.slane %v2654_v56, %v934_v57 }
0x1048   : > { %v2183_v26 = vpop.f32.mrf.mxu0 }
0x1049   : > { %2250 = vrot.lane.b32.xlu0 %v2249_v23, %s2348_s14 }
0x10bb   : > { %v2251_v22 = vpop.permute.xlu0 %2250 }
0x10bc   : > { %v2253_v27 = vunpack.i.h.bf16 %v2251_v22  ;;  %v2252_v28 = vunpack.i.l.bf16 %v2251_v22 }
0x10be   : > { %v1471_v29 = vsel %vm418_vm1, %v1333_v44, %v2253_v27  ;;  %v1470_v30 = vsel %vm418_vm1, %v1330_v41, %v2252_v28 }
0x10bf   : > { %v1472_v31 = vpack.c.bf16 %v1471_v29, %v1470_v30 }
0x10c1   : > { %2189 = vmatmul.mubr.msk.bf16.vlgmr.msra.gmra.mxu1 %vm516_vm3, %v1472_v31 }
0x10c2   : > { %2216 = vmatprep.mubr.msk.bf16.mxu1 %vm2342_vm0, %v2341_v1  ;;  %2201 = vmatpush3.bf16.msra.mxu1 %v2275_v61 }
0x10c3   : > { %2202 = vmatprep.subr.bf16.mxu1 %v2341_v1 }
0x10c6   : > { %2203 = vmatpush3.bf16.msra.mxu1 %v2276_v62 }
0x10c7   : > { %2204 = vmatprep.subr.bf16.mxu1 %v2341_v1 }
0x10ca   : > { %2205 = vmatpush3.bf16.msra.mxu1 %v2277_v63 }
0x10cb   : > { %2206 = vmatprep.subr.bf16.mxu1 %v2341_v1 }
0x10ce   : > { %2207 = vmatpush3.bf16.msra.mxu1 %v2278_v3 }
0x10cf   : > { %2208 = vmatprep.subr.bf16.mxu1 %v2341_v1 }
0x10d2   : > { %2209 = vmatpush3.bf16.msra.mxu1 %v2279_v4 }
0x10d3   : > { %2210 = vmatprep.subr.bf16.mxu1 %v2341_v1 }
0x10d6   : > { %2211 = vmatpush3.bf16.msra.mxu1 %v2280_v40 }
0x10d7   : > { %2212 = vmatprep.subr.bf16.mxu1 %v2341_v1 }
0x10da   : > { %2213 = vmatpush3.bf16.msra.mxu1 %v2281_v43 }
0x10db   : > { %2214 = vmatprep.subr.bf16.mxu1 %v2341_v1 }
0x10de   : > { %2215 = vmatpush3.bf16.msra.mxu1 %v2282_v20 }
0x1181   : > { %v1531_v34 = vpop.f32.mrf.mxu1 }
0x1182   : > { %v1532_v35 = vadd.f32 %v1531_v34, %v1481_v32  ;;  %v1667_v34 = vrot.slane %v2654_v56, %v1013_v6 }
0x1183   : > { %v2190_v36 = vpop.f32.mrf.mxu1 }
0x1184   : > { %v1538_v37 = vadd.f32 %v1532_v35, %v2642_v53 }
0x1185   : > { %v1534_v38 = vpop.f32.mrf.mxu1 }
0x1186   : > { %v1535_v39 = vadd.f32 %v1534_v38, %v1481_v32  ;;  %v1540_v42 = vsel %vm516_vm3, %v1538_v37, 0.0 }
0x1187   : > { %1541 = vadd.xlane.f32.xlu1 %v1540_v42  ;;  %v2191_v41 = vpop.f32.mrf.mxu1 }
0x1188   : > { %v1539_v44 = vadd.f32 %v1535_v39, %v2644_v54  ;;  %v2273_v54 = vld [vmem:[%s2818_s6 + $0x18] sm:$0xff]  }
0x1189   : > { %2193 = vmatpush3.bf16.msra.mxu0 %v2273_v54  ;;  %v2284_v54 = vld [vmem:[%s2822_s10] sm:$0xff]  }
0x118a   : > { %v1543_v47 = vsel %vm516_vm3, %v1539_v44, 0.0  ;;  %2194 = vmatprep.subr.bf16.mxu0 %v2341_v1 }
0x118b   : > { %1544 = vadd.xlane.f32.xlu0 %v1543_v47 }
0x118d   : > { %2195 = vmatpush3.bf16.msra.mxu0 %v2274_v60 }
0x118e   : > { %2220 = vmatprep.subr.bf16.mxu0 %v2341_v1 }
0x1210   : > { %v1542_v48 = vpop.xlane.xlu1 %1541 }
0x1211   : > { %v1546_v49 = vmul.f32 0.03125, %v1542_v48 }
0x1213   : > { %v1548_v50 = vsub.f32 %v1538_v37, %v1546_v49 }
0x1214   : > { %v1545_v0 = vpop.xlane.xlu0 %1544 }
0x1215   : > { %v1547_v51 = vmul.f32 0.03125, %v1545_v0  ;;  %v1550_v55 = vmul.f32 %v1548_v50, %v1548_v50 }
0x1217   : > { %v1549_v58 = vsub.f32 %v1539_v44, %v1547_v51  ;;  %v1552_v53 = vsel %vm516_vm3, %v1550_v55, 0.0 }
0x1218   : > { %1553 = vadd.xlane.f32.xlu1 %v1552_v53 }
0x1219   : > { %v1551_v25 = vmul.f32 %v1549_v58, %v1549_v58 }
0x121b   : > { %v1555_v59 = vsel %vm516_vm3, %v1551_v25, 0.0 }
0x121c   : > { %1556 = vadd.xlane.f32.xlu0 %v1555_v59  ;;  %v2283_v59 = vld [vmem:[%s2822_s10 + $0x8] sm:$0xff]  }
0x12a1   : > { %v1554_v24 = vpop.xlane.xlu1 %1553 }
0x12a2   : > { %v1558_v46 = vmul.f32 0.03125, %v1554_v24 }
0x12a4   : > { %v1560_v5 = vadd.f32 1e-05, %v1558_v46 }
0x12a5   : > { %v1557_v7 = vpop.xlane.xlu0 %1556 }
0x12a6   : > { %2325 = vrsqrt.f32 %v1560_v5  ;;  %v1559_v9 = vmul.f32 0.03125, %v1557_v7  ;;  %v1788_v5 = vrot.slane %v2654_v56, %v1134_v33 }
0x12a8   : > { %v1561_v10 = vadd.f32 1e-05, %v1559_v9 }
0x12aa   : > { %2327 = vrsqrt.f32 %v1561_v10 }
0x12b3   : > { %v2326_v52 = vpop.eup %2325 }
0x12b4   : > { %v1564_v11 = vmul.f32 %v2326_v52, %v1548_v50 }
0x12b6   : > { %v1570_v15 = vmul.f32 %v1569_v12, %v1564_v11 }
0x12b7   : > { %v2328_v13 = vpop.eup %2327 }
0x12b8   : > { %v1565_v14 = vmul.f32 %v2328_v13, %v1549_v58  ;;  %v1576_v2 = vadd.f32 %v1575_v16, %v1570_v15 }
0x12ba   : > { %v1571_v17 = vmul.f32 %v1569_v12, %v1565_v14  ;;  %v2013_v14 = vld [vmem:[%s2821_s9 + $0x1] ss:$0 sm:$0xff] }
0x12bc   : > { %v1577_v18 = vadd.f32 %v1575_v16, %v1571_v17 }
0x12be   : > { %v1578_v19 = vpack.c.bf16 %v1577_v18, %v1576_v2 }
0x12c0   : > { %2197 = vmatmul.mubr.msk.bf16.vlgmr.msra.gmra.mxu0 %vm516_vm3, %v1578_v19 }
0x12c1   : > { %2224 = vmatprep.mubr.msk.bf16.mxu0 %vm2342_vm0, %v2341_v1  ;;  %2221 = vmatpush3.bf16.msra.mxu0 %v2283_v59 }
0x12c2   : > { %2222 = vmatprep.subr.bf16.mxu0 %v2341_v1  ;;  %v1794_v1 = vrot.slane %v2654_v56, %v1140_v45 }
0x12c5   : > { %2223 = vmatpush3.bf16.msra.mxu0 %v2284_v54 }
0x1380   : > { %v1637_v23 = vpop.f32.mrf.mxu0 }
0x1381   : > { %v1638_v22 = vadd.f32 %v1637_v23, %v1587_v21 }
0x1382   : > { %v2198_v26 = vpop.f32.mrf.mxu0 }
0x1383   : > { %v1644_v30 = vmax.f32 %v1638_v22, 0.0 }
0x1384   : > { %v1640_v27 = vpop.f32.mrf.mxu0 }
0x1385   : > { %v1641_v28 = vadd.f32 %v1640_v27, %v1587_v21 }
0x1386   : > { %v2199_v29 = vpop.f32.mrf.mxu0 }
0x1387   : > { %v1645_v31 = vmax.f32 %v1641_v28, 0.0 }
0x1389   : > { %v1646_v32 = vpack.c.bf16 %v1645_v31, %v1644_v30 }
0x138b   : > { %2217 = vmatmul.mubr.bf16.vlgmr.msra.gmra.mxu1 %v1646_v32 }
0x144b   : > { %v1750_v35 = vpop.f32.mrf.mxu1 }
0x144c   : > { %v1751_v36 = vadd.f32 %v1750_v35, %v1667_v34 }
0x144d   : > { %v2218_v37 = vpop.f32.mrf.mxu1 }
0x144e   : > { %v1757_v38 = vadd.f32 %v1751_v36, %v1576_v2 }
0x144f   : > { %v1753_v39 = vpop.f32.mrf.mxu1 }
0x1450   : > { %v1754_v57 = vadd.f32 %v1753_v39, %v1667_v34  ;;  %v1759_v42 = vsel %vm516_vm3, %v1757_v38, 0.0 }
0x1451   : > { %1760 = vadd.xlane.f32.xlu1 %v1759_v42  ;;  %v2219_v41 = vpop.f32.mrf.mxu1 }
0x1452   : > { %v1758_v44 = vadd.f32 %v1754_v57, %v1577_v18 }
0x1454   : > { %v1762_v47 = vsel %vm516_vm3, %v1758_v44, 0.0 }
0x1455   : > { %1763 = vadd.xlane.f32.xlu0 %v1762_v47 }
0x14da   : > { %v1761_v48 = vpop.xlane.xlu1 %1760 }
0x14db   : > { %v1765_v49 = vmul.f32 0.03125, %v1761_v48 }
0x14dd   : > { %v1767_v50 = vsub.f32 %v1757_v38, %v1765_v49 }
0x14de   : > { %v1764_v0 = vpop.xlane.xlu0 %1763 }
0x14df   : > { %v1766_v51 = vmul.f32 0.03125, %v1764_v0  ;;  %v1769_v6 = vmul.f32 %v1767_v50, %v1767_v50 }
0x14e1   : > { %v1768_v55 = vsub.f32 %v1758_v44, %v1766_v51  ;;  %v1771_v58 = vsel %vm516_vm3, %v1769_v6, 0.0 }
0x14e2   : > { %1772 = vadd.xlane.f32.xlu1 %v1771_v58 }
0x14e3   : > { %v1770_v53 = vmul.f32 %v1768_v55, %v1768_v55 }
0x14e5   : > { %v1774_v25 = vsel %vm516_vm3, %v1770_v53, 0.0 }
0x14e6   : > { %1775 = vadd.xlane.f32.xlu0 %v1774_v25 }
0x156b   : > { %v1773_v60 = vpop.xlane.xlu1 %1772 }
0x156c   : > { %v1777_v61 = vmul.f32 0.03125, %v1773_v60 }
0x156e   : > { %v1779_v62 = vadd.f32 1e-05, %v1777_v61 }
0x156f   : > { %v1776_v63 = vpop.xlane.xlu0 %1775 }
0x1570   : > { %2329 = vrsqrt.f32 %v1779_v62  ;;  %v1778_v3 = vmul.f32 0.03125, %v1776_v63 }
0x1572   : > { %v1780_v4 = vadd.f32 1e-05, %v1778_v3 }
0x1574   : > { %2331 = vrsqrt.f32 %v1780_v4 }
0x157d   : > { %v2330_v24 = vpop.eup %2329 }
0x157e   : > { %v1783_v46 = vmul.f32 %v2330_v24, %v1767_v50 }
0x1580   : > { %v1789_v10 = vmul.f32 %v1788_v5, %v1783_v46 }
0x1581   : > { %v2332_v7 = vpop.eup %2331 }
0x1582   : > { %v1784_v9 = vmul.f32 %v2332_v7, %v1768_v55  ;;  %v1795_v11 = vadd.f32 %v1794_v1, %v1789_v10 }
0x1584   : > { %v1790_v52 = vmul.f32 %v1788_v5, %v1784_v9 }
0x1586   : > { %v1796_v12 = vadd.f32 %v1794_v1, %v1790_v52 }
0x1588   : > { %v1797_v13 = vpack.c.bf16 %v1796_v12, %v1795_v11 }
0x158a   : > { %2225 = vmatmul.mubr.msk.bf16.vlgmr.msra.gmra.mxu0 %vm516_vm3, %v1797_v13 }
0x164a   : > { %v1856_v33 = vpop.f32.mrf.mxu0 }
0x164b   : > { %v1857_v15 = vadd.f32 %v2013_v14, %v1856_v33 }
0x164c   : > { %v2226_v8 = vpop.f32.mrf.mxu0 }
0x164d   : > { %1863 = vst [vmem:[%s400_s24] sm:$0xff] %v1857_v15 }
0x164e   : > { %v1859_v45 = vpop.f32.mrf.mxu0 }
0x164f   : > { %v1860_v56 = vadd.f32 %v2013_v14, %v1859_v45 }
0x1650   : > { %v2227_v16 = vpop.f32.mrf.mxu0 }
0x1651   : > { %1864 = vst [vmem:[%s400_s24 + $0x8] sm:$0xff] %v1860_v56 }
0x1652 PF: > { %s21_s17 = sadd.s32 1, %s2339_s17  }
0x1653   : > { %p18_p4 = scmp.ge.s32.totalorder %s21_s17, 4  }
0x1655   :  { %20 = sbr.rel (!%p18_p4) target bundleno = 1 (0x1), region = 102 }

</bundles_post_ra>
